<compile_context>
chip_gen: v7x
topology: tpu7x:2x2x1
jax: 0.10.0
libtpu: 0.0.40
codegen_flags: <defaults>
</compile_context>

<pallas_src>
import functools
import math

import jax
import jax.numpy as jnp
import numpy as np
from jax.experimental import pallas as pl
from jax.experimental.pallas import tpu as pltpu


# ------------------------------------------------------------------ helpers
def _cdiv(a, b):
    return -(-a // b)


def _round_up(v, m):
    return _cdiv(v, m) * m


def _choose_rows(nc, hw, itemsize, *, mult, target_block_bytes=4 << 20):
    """Rows (N*C chunk) per block.

    rows is a multiple of `mult` (8 suffices for the avg path; 128 for the max
    path because rows become the lane dim of its output block) or the full nc.
    Sized to ~target_block_bytes per input buffer, with >=2 grid steps for
    larger nc so BlockSpec double-buffering overlaps the HBM DMA with compute
    and megacore parts can shard the "parallel" axis.
    """
    if nc <= mult:
        return nc, 1
    rows = (target_block_bytes // max(1, hw * itemsize)) // mult * mult
    rows = max(mult, rows)
    want_steps = 4 if nc >= 8 * mult else 2
    rows = min(rows, _round_up(_cdiv(nc, want_steps), mult))
    if rows >= nc:
        return nc, 1
    rows = int(rows)
    return rows, _cdiv(nc, rows)


def _vmem_limit_bytes(*block_bytes):
    # 2x for the double-buffered pipeline copies, 1.5x for in-kernel
    # temporaries (transposed copy / stage-1 partials), plus fixed slack.
    # Clamped to a range safe on both 128 MiB (v5e/v6e) and 64 MiB (v7x) VMEM.
    need = int(sum(2 * b for b in block_bytes) * 1.5) + (4 << 20)
    return int(min(max(need, 32 << 20), 48 << 20))


# ------------------------------------------------------------------ geometry
def _level_geometry(h, w, num_levels):
    """Static per-level pooling geometry, computed exactly like the PyTorch forward."""
    levels = []
    for i in range(num_levels):
        level = i + 1
        kernel = (math.ceil(h / level), math.ceil(w / level))
        pad = (math.floor((kernel[0] * level - h + 1) / 2),
               math.floor((kernel[1] * level - w + 1) / 2))
        h_new, w_new = h + 2 * pad[0], w + 2 * pad[1]
        kernel = (math.ceil(h_new / level), math.ceil(w_new / level))
        stride = (math.floor(h_new / level), math.floor(w_new / level))
        oh = (h_new - kernel[0]) // stride[0] + 1   # F.max_pool2d, ceil_mode=False
        ow = (w_new - kernel[1]) // stride[1] + 1
        yranges, xranges = [], []
        for oy in range(oh):
            y0p, y1p = oy * stride[0], oy * stride[0] + kernel[0]
            y0, y1 = max(y0p - pad[0], 0), min(y1p - pad[0], h)
            yranges.append((y0, y1, (y0p - pad[0] < 0) or (y1p - pad[0] > h)))
        for ox in range(ow):
            x0p, x1p = ox * stride[1], ox * stride[1] + kernel[1]
            x0, x1 = max(x0p - pad[1], 0), min(x1p - pad[1], w)
            xranges.append((x0, x1, (x0p - pad[1] < 0) or (x1p - pad[1] > w)))
        levels.append(dict(kernel=kernel, out=(oh, ow),
                           yranges=yranges, xranges=xranges))
    return levels


def _avg_pool_matrix(h, w, levels):
    """(total_bins, h*w) constant so avg_pool becomes one MXU matmul.

    ZeroPad2d zeros contribute 0 to the sum and the divisor is always kh*kw,
    matching explicit zero-padding followed by F.avg_pool2d.
    """
    total = sum(lv['out'][0] * lv['out'][1] for lv in levels)
    pm = np.zeros((total, h * w), np.float32)
    b = 0
    for lv in levels:
        kh, kw = lv['kernel']
        inv = 1.0 / float(kh * kw)
        for (y0, y1, _) in lv['yranges']:
            for (x0, x1, _) in lv['xranges']:
                for y in range(y0, y1):
                    pm[b, y * w + x0:y * w + x1] = inv
                b += 1
    return pm


# ------------------------------------------------------------------- kernels
def _spp_max_kernel(x_ref, o_ref, *, h, w, levels):
    # x_ref: (tile, h*w)  -- natural HBM layout, no pre-kernel relayout.
    # o_ref: (total_bins, tile) -- bins on sublanes, the N*C chunk lane-dense.
    # One in-kernel XLU transpose replaces the old full-tensor HBM transpose
    # round trip; it is hidden under this mem-bound kernel's block DMA.
    xt = jnp.transpose(x_ref[...], (1, 0))                 # (h*w, tile)
    cols = []
    for lv in levels:
        # Stage 1: per (row y, output column ox) partial max over the x-window.
        # Contiguous sublane-range slices; each partial is shared by every
        # output row (y-range) of this level.
        parts = []
        for y in range(h):
            parts.append([
                jnp.max(xt[y * w + x0:y * w + x1, :], axis=0, keepdims=True)
                for (x0, x1, _) in lv['xranges']])          # (1, tile) each
        # Stage 2: per bin, pure-VPU elementwise max over the y-window.
        for (y0, y1, ypad) in lv['yranges']:
            for oxi, (_, _, xpad) in enumerate(lv['xranges']):
                m = parts[y0][oxi]
                for y in range(y0 + 1, y1):
                    m = jnp.maximum(m, parts[y][oxi])
                if ypad or xpad:
                    # ZeroPad2d zeros participate in the max.
                    m = jnp.maximum(m, jnp.zeros_like(m))
                cols.append(m)
    # Single lane-dense store for the whole block.
    o_ref[...] = jnp.concatenate(cols, axis=0).astype(o_ref.dtype)


def _spp_avg_kernel(x_ref, pmt_ref, o_ref):
    # x_ref: (tile, h*w); pmt_ref: (h*w, total_bins) f32; o_ref: (tile, total_bins)
    # HIGH (bf16x3) instead of HIGHEST: half the MXU passes, ~f32 accuracy.
    acc = jnp.dot(x_ref[...].astype(jnp.float32), pmt_ref[...],
                  precision=jax.lax.Precision.HIGH,
                  preferred_element_type=jnp.float32)
    o_ref[...] = acc.astype(o_ref.dtype)


# ------------------------------------------------------------------- wrapper
def spp_forward(x, num_levels=3, pool_type='max_pool'):
    n, c, h, w = x.shape
    hw, nc = h * w, n * c
    levels = _level_geometry(h, w, num_levels)
    bins_per_level = [lv['out'][0] * lv['out'][1] for lv in levels]
    total_bins = sum(bins_per_level)
    itemsize = jnp.dtype(x.dtype).itemsize

    # Free, contiguous view: pixels lane-dense, N*C on the sublane/grid axis.
    xf = x.reshape(nc, hw)

    if pool_type == 'max_pool':
        tile, grid = _choose_rows(nc, hw, itemsize, mult=128)
        in_block = tile * hw * itemsize
        out_block = total_bins * tile * itemsize
        kern = functools.partial(_spp_max_kernel, h=h, w=w, levels=levels)
        out = pl.pallas_call(
            kern,
            out_shape=jax.ShapeDtypeStruct((total_bins, nc), x.dtype),
            grid=(grid,),
            in_specs=[pl.BlockSpec((tile, hw), lambda i: (i, 0))],
            out_specs=pl.BlockSpec((total_bins, tile), lambda i: (0, i)),
            compiler_params=pltpu.CompilerParams(
                dimension_semantics=("parallel",),
                vmem_limit_bytes=_vmem_limit_bytes(in_block, out_block)),
        )(xf)
        # Tiny (total_bins x nc) post-transpose; negligible vs. the input read.
        out3 = jnp.transpose(out, (1, 0)).reshape(n, c, total_bins)
    else:  # avg_pool: one small MXU matmul per block, no relayout anywhere.
        tile, grid = _choose_rows(nc, hw, itemsize, mult=8)
        pmt = jnp.asarray(_avg_pool_matrix(h, w, levels).T)   # (hw, total_bins)
        in_block = tile * hw * itemsize
        out_block = total_bins * tile * itemsize
        pm_block = hw * total_bins * 4
        out = pl.pallas_call(
            _spp_avg_kernel,
            out_shape=jax.ShapeDtypeStruct((nc, total_bins), x.dtype),
            grid=(grid,),
            in_specs=[pl.BlockSpec((tile, hw), lambda i: (i, 0)),
                      pl.BlockSpec((hw, total_bins), lambda i: (0, 0))],
            out_specs=pl.BlockSpec((tile, total_bins), lambda i: (i, 0)),
            compiler_params=pltpu.CompilerParams(
                dimension_semantics=("parallel",),
                vmem_limit_bytes=_vmem_limit_bytes(in_block, pm_block, out_block)),
        )(xf, pmt)
        out3 = out.reshape(n, c, total_bins)

    # Reassemble PyTorch's concat order: per level, (num, c*oh*ow).
    parts, off = [], 0
    for nb in bins_per_level:
        parts.append(out3[:, :, off:off + nb].reshape(n, c * nb))
        off += nb
    return jnp.concatenate(parts, axis=1)


# ---------------------------------------------------------------- reference
def _ref_spp(x_np, num_levels=3, pool_type='max_pool'):
    """Pure-numpy replication of the PyTorch forward (max and avg)."""
    n, c, h, w = x_np.shape
    outs = []
    for i in range(num_levels):
        level = i + 1
        kernel = (math.ceil(h / level), math.ceil(w / level))
        pooling = (math.floor((kernel[0] * level - h + 1) / 2),
                   math.floor((kernel[1] * level - w + 1) / 2))
        xp = np.zeros((n, c, h + 2 * pooling[0], w + 2 * pooling[1]), np.float64)
        xp[:, :, pooling[0]:pooling[0] + h, pooling[1]:pooling[1] + w] = x_np
        h_new, w_new = xp.shape[2], xp.shape[3]
        kernel = (math.ceil(h_new / level), math.ceil(w_new / level))
        stride = (math.floor(h_new / level), math.floor(w_new / level))
        oh = (h_new - kernel[0]) // stride[0] + 1
        ow = (w_new - kernel[1]) // stride[1] + 1
        pooled = np.zeros((n, c, oh, ow), np.float64)
        for oy in range(oh):
            for ox in range(ow):
                win = xp[:, :, oy * stride[0]:oy * stride[0] + kernel[0],
                         ox * stride[1]:ox * stride[1] + kernel[1]]
                if pool_type == 'max_pool':
                    pooled[:, :, oy, ox] = win.max(axis=(2, 3))
                else:
                    pooled[:, :, oy, ox] = win.mean(axis=(2, 3))
        outs.append(pooled.reshape(n, -1))
    return np.concatenate(outs, axis=1)


if __name__ == "__main__":
    # SPPNet has no learnable parameters; only the input tensor is needed.
    key = jax.random.PRNGKey(0)
    x = jax.random.normal(key, (2, 4, 16, 16), dtype=jnp.float32)

    out_max = jax.block_until_ready(spp_forward(x, num_levels=3, pool_type='max_pool'))
    ref_max = _ref_spp(np.asarray(x), num_levels=3, pool_type='max_pool')
    assert out_max.shape == ref_max.shape, (out_max.shape, ref_max.shape)
    np.testing.assert_allclose(np.asarray(out_max), ref_max, rtol=1e-6, atol=1e-6)

    out_avg = jax.block_until_ready(spp_forward(x, num_levels=3, pool_type='avg_pool'))
    ref_avg = _ref_spp(np.asarray(x), num_levels=3, pool_type='avg_pool')
    assert out_avg.shape == ref_avg.shape, (out_avg.shape, ref_avg.shape)
    np.testing.assert_allclose(np.asarray(out_avg), ref_avg, rtol=1e-4, atol=1e-4)

    print("KERNEL_OK")
</pallas_src>

<mosaic_0001>
module attributes {stable_mosaic.version = 11 : i64} {
  func.func @_spp_max_kernel(%arg0: i32, %arg1: memref<8x256xf32, #tpu.memory_space<vmem>>, %arg2: memref<14x8xf32, #tpu.memory_space<vmem>>) attributes {dimension_semantics = [#tpu.dimension_semantics<parallel>], iteration_bounds = array<i64: 1>, scalar_prefetch = 0 : i64, scratch_operands = 0 : i64, tpu.core_type = #tpu.core_type<tc>, window_params = [{transform_indices = @transform_0, window_bounds = array<i64: 8, 256>}, {transform_indices = @transform_1, window_bounds = array<i64: 14, 8>}]} {
    %c0 = arith.constant 0 : index
    %c0_0 = arith.constant 0 : index
    %0 = vector.load %arg1[%c0, %c0_0] : memref<8x256xf32, #tpu.memory_space<vmem>>, vector<8x256xf32>
    %1 = tpu.transpose %0, [1, 0] : vector<8x256xf32> -> vector<256x8xf32>
    %2 = vector.extract_strided_slice %1 {offsets = [0, 0], sizes = [16, 8], strides = [1, 1]} : vector<256x8xf32> to vector<16x8xf32>
    %cst = arith.constant dense<0xFF800000> : vector<8xf32>
    %3 = vector.multi_reduction <maximumf>, %2, %cst [0] : vector<16x8xf32> to vector<8xf32>
    %4 = vector.shape_cast %3 : vector<8xf32> to vector<1x8xf32>
    %5 = vector.extract_strided_slice %1 {offsets = [16, 0], sizes = [16, 8], strides = [1, 1]} : vector<256x8xf32> to vector<16x8xf32>
    %cst_1 = arith.constant dense<0xFF800000> : vector<8xf32>
    %6 = vector.multi_reduction <maximumf>, %5, %cst_1 [0] : vector<16x8xf32> to vector<8xf32>
    %7 = vector.shape_cast %6 : vector<8xf32> to vector<1x8xf32>
    %8 = vector.extract_strided_slice %1 {offsets = [32, 0], sizes = [16, 8], strides = [1, 1]} : vector<256x8xf32> to vector<16x8xf32>
    %cst_2 = arith.constant dense<0xFF800000> : vector<8xf32>
    %9 = vector.multi_reduction <maximumf>, %8, %cst_2 [0] : vector<16x8xf32> to vector<8xf32>
    %10 = vector.shape_cast %9 : vector<8xf32> to vector<1x8xf32>
    %11 = vector.extract_strided_slice %1 {offsets = [48, 0], sizes = [16, 8], strides = [1, 1]} : vector<256x8xf32> to vector<16x8xf32>
    %cst_3 = arith.constant dense<0xFF800000> : vector<8xf32>
    %12 = vector.multi_reduction <maximumf>, %11, %cst_3 [0] : vector<16x8xf32> to vector<8xf32>
    %13 = vector.shape_cast %12 : vector<8xf32> to vector<1x8xf32>
    %14 = vector.extract_strided_slice %1 {offsets = [64, 0], sizes = [16, 8], strides = [1, 1]} : vector<256x8xf32> to vector<16x8xf32>
    %cst_4 = arith.constant dense<0xFF800000> : vector<8xf32>
    %15 = vector.multi_reduction <maximumf>, %14, %cst_4 [0] : vector<16x8xf32> to vector<8xf32>
    %16 = vector.shape_cast %15 : vector<8xf32> to vector<1x8xf32>
    %17 = vector.extract_strided_slice %1 {offsets = [80, 0], sizes = [16, 8], strides = [1, 1]} : vector<256x8xf32> to vector<16x8xf32>
    %cst_5 = arith.constant dense<0xFF800000> : vector<8xf32>
    %18 = vector.multi_reduction <maximumf>, %17, %cst_5 [0] : vector<16x8xf32> to vector<8xf32>
    %19 = vector.shape_cast %18 : vector<8xf32> to vector<1x8xf32>
    %20 = vector.extract_strided_slice %1 {offsets = [96, 0], sizes = [16, 8], strides = [1, 1]} : vector<256x8xf32> to vector<16x8xf32>
    %cst_6 = arith.constant dense<0xFF800000> : vector<8xf32>
    %21 = vector.multi_reduction <maximumf>, %20, %cst_6 [0] : vector<16x8xf32> to vector<8xf32>
    %22 = vector.shape_cast %21 : vector<8xf32> to vector<1x8xf32>
    %23 = vector.extract_strided_slice %1 {offsets = [112, 0], sizes = [16, 8], strides = [1, 1]} : vector<256x8xf32> to vector<16x8xf32>
    %cst_7 = arith.constant dense<0xFF800000> : vector<8xf32>
    %24 = vector.multi_reduction <maximumf>, %23, %cst_7 [0] : vector<16x8xf32> to vector<8xf32>
    %25 = vector.shape_cast %24 : vector<8xf32> to vector<1x8xf32>
    %26 = vector.extract_strided_slice %1 {offsets = [128, 0], sizes = [16, 8], strides = [1, 1]} : vector<256x8xf32> to vector<16x8xf32>
    %cst_8 = arith.constant dense<0xFF800000> : vector<8xf32>
    %27 = vector.multi_reduction <maximumf>, %26, %cst_8 [0] : vector<16x8xf32> to vector<8xf32>
    %28 = vector.shape_cast %27 : vector<8xf32> to vector<1x8xf32>
    %29 = vector.extract_strided_slice %1 {offsets = [144, 0], sizes = [16, 8], strides = [1, 1]} : vector<256x8xf32> to vector<16x8xf32>
    %cst_9 = arith.constant dense<0xFF800000> : vector<8xf32>
    %30 = vector.multi_reduction <maximumf>, %29, %cst_9 [0] : vector<16x8xf32> to vector<8xf32>
    %31 = vector.shape_cast %30 : vector<8xf32> to vector<1x8xf32>
    %32 = vector.extract_strided_slice %1 {offsets = [160, 0], sizes = [16, 8], strides = [1, 1]} : vector<256x8xf32> to vector<16x8xf32>
    %cst_10 = arith.constant dense<0xFF800000> : vector<8xf32>
    %33 = vector.multi_reduction <maximumf>, %32, %cst_10 [0] : vector<16x8xf32> to vector<8xf32>
    %34 = vector.shape_cast %33 : vector<8xf32> to vector<1x8xf32>
    %35 = vector.extract_strided_slice %1 {offsets = [176, 0], sizes = [16, 8], strides = [1, 1]} : vector<256x8xf32> to vector<16x8xf32>
    %cst_11 = arith.constant dense<0xFF800000> : vector<8xf32>
    %36 = vector.multi_reduction <maximumf>, %35, %cst_11 [0] : vector<16x8xf32> to vector<8xf32>
    %37 = vector.shape_cast %36 : vector<8xf32> to vector<1x8xf32>
    %38 = vector.extract_strided_slice %1 {offsets = [192, 0], sizes = [16, 8], strides = [1, 1]} : vector<256x8xf32> to vector<16x8xf32>
    %cst_12 = arith.constant dense<0xFF800000> : vector<8xf32>
    %39 = vector.multi_reduction <maximumf>, %38, %cst_12 [0] : vector<16x8xf32> to vector<8xf32>
    %40 = vector.shape_cast %39 : vector<8xf32> to vector<1x8xf32>
    %41 = vector.extract_strided_slice %1 {offsets = [208, 0], sizes = [16, 8], strides = [1, 1]} : vector<256x8xf32> to vector<16x8xf32>
    %cst_13 = arith.constant dense<0xFF800000> : vector<8xf32>
    %42 = vector.multi_reduction <maximumf>, %41, %cst_13 [0] : vector<16x8xf32> to vector<8xf32>
    %43 = vector.shape_cast %42 : vector<8xf32> to vector<1x8xf32>
    %44 = vector.extract_strided_slice %1 {offsets = [224, 0], sizes = [16, 8], strides = [1, 1]} : vector<256x8xf32> to vector<16x8xf32>
    %cst_14 = arith.constant dense<0xFF800000> : vector<8xf32>
    %45 = vector.multi_reduction <maximumf>, %44, %cst_14 [0] : vector<16x8xf32> to vector<8xf32>
    %46 = vector.shape_cast %45 : vector<8xf32> to vector<1x8xf32>
    %47 = vector.extract_strided_slice %1 {offsets = [240, 0], sizes = [16, 8], strides = [1, 1]} : vector<256x8xf32> to vector<16x8xf32>
    %cst_15 = arith.constant dense<0xFF800000> : vector<8xf32>
    %48 = vector.multi_reduction <maximumf>, %47, %cst_15 [0] : vector<16x8xf32> to vector<8xf32>
    %49 = vector.shape_cast %48 : vector<8xf32> to vector<1x8xf32>
    %50 = arith.maximumf %4, %7 : vector<1x8xf32>
    %51 = arith.maximumf %50, %10 : vector<1x8xf32>
    %52 = arith.maximumf %51, %13 : vector<1x8xf32>
    %53 = arith.maximumf %52, %16 : vector<1x8xf32>
    %54 = arith.maximumf %53, %19 : vector<1x8xf32>
    %55 = arith.maximumf %54, %22 : vector<1x8xf32>
    %56 = arith.maximumf %55, %25 : vector<1x8xf32>
    %57 = arith.maximumf %56, %28 : vector<1x8xf32>
    %58 = arith.maximumf %57, %31 : vector<1x8xf32>
    %59 = arith.maximumf %58, %34 : vector<1x8xf32>
    %60 = arith.maximumf %59, %37 : vector<1x8xf32>
    %61 = arith.maximumf %60, %40 : vector<1x8xf32>
    %62 = arith.maximumf %61, %43 : vector<1x8xf32>
    %63 = arith.maximumf %62, %46 : vector<1x8xf32>
    %64 = arith.maximumf %63, %49 : vector<1x8xf32>
    %65 = vector.extract_strided_slice %1 {offsets = [0, 0], sizes = [8, 8], strides = [1, 1]} : vector<256x8xf32> to vector<8x8xf32>
    %cst_16 = arith.constant dense<0xFF800000> : vector<8xf32>
    %66 = vector.multi_reduction <maximumf>, %65, %cst_16 [0] : vector<8x8xf32> to vector<8xf32>
    %67 = vector.shape_cast %66 : vector<8xf32> to vector<1x8xf32>
    %68 = vector.extract_strided_slice %1 {offsets = [8, 0], sizes = [8, 8], strides = [1, 1]} : vector<256x8xf32> to vector<8x8xf32>
    %cst_17 = arith.constant dense<0xFF800000> : vector<8xf32>
    %69 = vector.multi_reduction <maximumf>, %68, %cst_17 [0] : vector<8x8xf32> to vector<8xf32>
    %70 = vector.shape_cast %69 : vector<8xf32> to vector<1x8xf32>
    %71 = vector.extract_strided_slice %1 {offsets = [16, 0], sizes = [8, 8], strides = [1, 1]} : vector<256x8xf32> to vector<8x8xf32>
    %cst_18 = arith.constant dense<0xFF800000> : vector<8xf32>
    %72 = vector.multi_reduction <maximumf>, %71, %cst_18 [0] : vector<8x8xf32> to vector<8xf32>
    %73 = vector.shape_cast %72 : vector<8xf32> to vector<1x8xf32>
    %74 = vector.extract_strided_slice %1 {offsets = [24, 0], sizes = [8, 8], strides = [1, 1]} : vector<256x8xf32> to vector<8x8xf32>
    %cst_19 = arith.constant dense<0xFF800000> : vector<8xf32>
    %75 = vector.multi_reduction <maximumf>, %74, %cst_19 [0] : vector<8x8xf32> to vector<8xf32>
    %76 = vector.shape_cast %75 : vector<8xf32> to vector<1x8xf32>
    %77 = vector.extract_strided_slice %1 {offsets = [32, 0], sizes = [8, 8], strides = [1, 1]} : vector<256x8xf32> to vector<8x8xf32>
    %cst_20 = arith.constant dense<0xFF800000> : vector<8xf32>
    %78 = vector.multi_reduction <maximumf>, %77, %cst_20 [0] : vector<8x8xf32> to vector<8xf32>
    %79 = vector.shape_cast %78 : vector<8xf32> to vector<1x8xf32>
    %80 = vector.extract_strided_slice %1 {offsets = [40, 0], sizes = [8, 8], strides = [1, 1]} : vector<256x8xf32> to vector<8x8xf32>
    %cst_21 = arith.constant dense<0xFF800000> : vector<8xf32>
    %81 = vector.multi_reduction <maximumf>, %80, %cst_21 [0] : vector<8x8xf32> to vector<8xf32>
    %82 = vector.shape_cast %81 : vector<8xf32> to vector<1x8xf32>
    %83 = vector.extract_strided_slice %1 {offsets = [48, 0], sizes = [8, 8], strides = [1, 1]} : vector<256x8xf32> to vector<8x8xf32>
    %cst_22 = arith.constant dense<0xFF800000> : vector<8xf32>
    %84 = vector.multi_reduction <maximumf>, %83, %cst_22 [0] : vector<8x8xf32> to vector<8xf32>
    %85 = vector.shape_cast %84 : vector<8xf32> to vector<1x8xf32>
    %86 = vector.extract_strided_slice %1 {offsets = [56, 0], sizes = [8, 8], strides = [1, 1]} : vector<256x8xf32> to vector<8x8xf32>
    %cst_23 = arith.constant dense<0xFF800000> : vector<8xf32>
    %87 = vector.multi_reduction <maximumf>, %86, %cst_23 [0] : vector<8x8xf32> to vector<8xf32>
    %88 = vector.shape_cast %87 : vector<8xf32> to vector<1x8xf32>
    %89 = vector.extract_strided_slice %1 {offsets = [64, 0], sizes = [8, 8], strides = [1, 1]} : vector<256x8xf32> to vector<8x8xf32>
    %cst_24 = arith.constant dense<0xFF800000> : vector<8xf32>
    %90 = vector.multi_reduction <maximumf>, %89, %cst_24 [0] : vector<8x8xf32> to vector<8xf32>
    %91 = vector.shape_cast %90 : vector<8xf32> to vector<1x8xf32>
    %92 = vector.extract_strided_slice %1 {offsets = [72, 0], sizes = [8, 8], strides = [1, 1]} : vector<256x8xf32> to vector<8x8xf32>
    %cst_25 = arith.constant dense<0xFF800000> : vector<8xf32>
    %93 = vector.multi_reduction <maximumf>, %92, %cst_25 [0] : vector<8x8xf32> to vector<8xf32>
    %94 = vector.shape_cast %93 : vector<8xf32> to vector<1x8xf32>
    %95 = vector.extract_strided_slice %1 {offsets = [80, 0], sizes = [8, 8], strides = [1, 1]} : vector<256x8xf32> to vector<8x8xf32>
    %cst_26 = arith.constant dense<0xFF800000> : vector<8xf32>
    %96 = vector.multi_reduction <maximumf>, %95, %cst_26 [0] : vector<8x8xf32> to vector<8xf32>
    %97 = vector.shape_cast %96 : vector<8xf32> to vector<1x8xf32>
    %98 = vector.extract_strided_slice %1 {offsets = [88, 0], sizes = [8, 8], strides = [1, 1]} : vector<256x8xf32> to vector<8x8xf32>
    %cst_27 = arith.constant dense<0xFF800000> : vector<8xf32>
    %99 = vector.multi_reduction <maximumf>, %98, %cst_27 [0] : vector<8x8xf32> to vector<8xf32>
    %100 = vector.shape_cast %99 : vector<8xf32> to vector<1x8xf32>
    %101 = vector.extract_strided_slice %1 {offsets = [96, 0], sizes = [8, 8], strides = [1, 1]} : vector<256x8xf32> to vector<8x8xf32>
    %cst_28 = arith.constant dense<0xFF800000> : vector<8xf32>
    %102 = vector.multi_reduction <maximumf>, %101, %cst_28 [0] : vector<8x8xf32> to vector<8xf32>
    %103 = vector.shape_cast %102 : vector<8xf32> to vector<1x8xf32>
    %104 = vector.extract_strided_slice %1 {offsets = [104, 0], sizes = [8, 8], strides = [1, 1]} : vector<256x8xf32> to vector<8x8xf32>
    %cst_29 = arith.constant dense<0xFF800000> : vector<8xf32>
    %105 = vector.multi_reduction <maximumf>, %104, %cst_29 [0] : vector<8x8xf32> to vector<8xf32>
    %106 = vector.shape_cast %105 : vector<8xf32> to vector<1x8xf32>
    %107 = vector.extract_strided_slice %1 {offsets = [112, 0], sizes = [8, 8], strides = [1, 1]} : vector<256x8xf32> to vector<8x8xf32>
    %cst_30 = arith.constant dense<0xFF800000> : vector<8xf32>
    %108 = vector.multi_reduction <maximumf>, %107, %cst_30 [0] : vector<8x8xf32> to vector<8xf32>
    %109 = vector.shape_cast %108 : vector<8xf32> to vector<1x8xf32>
    %110 = vector.extract_strided_slice %1 {offsets = [120, 0], sizes = [8, 8], strides = [1, 1]} : vector<256x8xf32> to vector<8x8xf32>
    %cst_31 = arith.constant dense<0xFF800000> : vector<8xf32>
    %111 = vector.multi_reduction <maximumf>, %110, %cst_31 [0] : vector<8x8xf32> to vector<8xf32>
    %112 = vector.shape_cast %111 : vector<8xf32> to vector<1x8xf32>
    %113 = vector.extract_strided_slice %1 {offsets = [128, 0], sizes = [8, 8], strides = [1, 1]} : vector<256x8xf32> to vector<8x8xf32>
    %cst_32 = arith.constant dense<0xFF800000> : vector<8xf32>
    %114 = vector.multi_reduction <maximumf>, %113, %cst_32 [0] : vector<8x8xf32> to vector<8xf32>
    %115 = vector.shape_cast %114 : vector<8xf32> to vector<1x8xf32>
    %116 = vector.extract_strided_slice %1 {offsets = [136, 0], sizes = [8, 8], strides = [1, 1]} : vector<256x8xf32> to vector<8x8xf32>
    %cst_33 = arith.constant dense<0xFF800000> : vector<8xf32>
    %117 = vector.multi_reduction <maximumf>, %116, %cst_33 [0] : vector<8x8xf32> to vector<8xf32>
    %118 = vector.shape_cast %117 : vector<8xf32> to vector<1x8xf32>
    %119 = vector.extract_strided_slice %1 {offsets = [144, 0], sizes = [8, 8], strides = [1, 1]} : vector<256x8xf32> to vector<8x8xf32>
    %cst_34 = arith.constant dense<0xFF800000> : vector<8xf32>
    %120 = vector.multi_reduction <maximumf>, %119, %cst_34 [0] : vector<8x8xf32> to vector<8xf32>
    %121 = vector.shape_cast %120 : vector<8xf32> to vector<1x8xf32>
    %122 = vector.extract_strided_slice %1 {offsets = [152, 0], sizes = [8, 8], strides = [1, 1]} : vector<256x8xf32> to vector<8x8xf32>
    %cst_35 = arith.constant dense<0xFF800000> : vector<8xf32>
    %123 = vector.multi_reduction <maximumf>, %122, %cst_35 [0] : vector<8x8xf32> to vector<8xf32>
    %124 = vector.shape_cast %123 : vector<8xf32> to vector<1x8xf32>
    %125 = vector.extract_strided_slice %1 {offsets = [160, 0], sizes = [8, 8], strides = [1, 1]} : vector<256x8xf32> to vector<8x8xf32>
    %cst_36 = arith.constant dense<0xFF800000> : vector<8xf32>
    %126 = vector.multi_reduction <maximumf>, %125, %cst_36 [0] : vector<8x8xf32> to vector<8xf32>
    %127 = vector.shape_cast %126 : vector<8xf32> to vector<1x8xf32>
    %128 = vector.extract_strided_slice %1 {offsets = [168, 0], sizes = [8, 8], strides = [1, 1]} : vector<256x8xf32> to vector<8x8xf32>
    %cst_37 = arith.constant dense<0xFF800000> : vector<8xf32>
    %129 = vector.multi_reduction <maximumf>, %128, %cst_37 [0] : vector<8x8xf32> to vector<8xf32>
    %130 = vector.shape_cast %129 : vector<8xf32> to vector<1x8xf32>
    %131 = vector.extract_strided_slice %1 {offsets = [176, 0], sizes = [8, 8], strides = [1, 1]} : vector<256x8xf32> to vector<8x8xf32>
    %cst_38 = arith.constant dense<0xFF800000> : vector<8xf32>
    %132 = vector.multi_reduction <maximumf>, %131, %cst_38 [0] : vector<8x8xf32> to vector<8xf32>
    %133 = vector.shape_cast %132 : vector<8xf32> to vector<1x8xf32>
    %134 = vector.extract_strided_slice %1 {offsets = [184, 0], sizes = [8, 8], strides = [1, 1]} : vector<256x8xf32> to vector<8x8xf32>
    %cst_39 = arith.constant dense<0xFF800000> : vector<8xf32>
    %135 = vector.multi_reduction <maximumf>, %134, %cst_39 [0] : vector<8x8xf32> to vector<8xf32>
    %136 = vector.shape_cast %135 : vector<8xf32> to vector<1x8xf32>
    %137 = vector.extract_strided_slice %1 {offsets = [192, 0], sizes = [8, 8], strides = [1, 1]} : vector<256x8xf32> to vector<8x8xf32>
    %cst_40 = arith.constant dense<0xFF800000> : vector<8xf32>
    %138 = vector.multi_reduction <maximumf>, %137, %cst_40 [0] : vector<8x8xf32> to vector<8xf32>
    %139 = vector.shape_cast %138 : vector<8xf32> to vector<1x8xf32>
    %140 = vector.extract_strided_slice %1 {offsets = [200, 0], sizes = [8, 8], strides = [1, 1]} : vector<256x8xf32> to vector<8x8xf32>
    %cst_41 = arith.constant dense<0xFF800000> : vector<8xf32>
    %141 = vector.multi_reduction <maximumf>, %140, %cst_41 [0] : vector<8x8xf32> to vector<8xf32>
    %142 = vector.shape_cast %141 : vector<8xf32> to vector<1x8xf32>
    %143 = vector.extract_strided_slice %1 {offsets = [208, 0], sizes = [8, 8], strides = [1, 1]} : vector<256x8xf32> to vector<8x8xf32>
    %cst_42 = arith.constant dense<0xFF800000> : vector<8xf32>
    %144 = vector.multi_reduction <maximumf>, %143, %cst_42 [0] : vector<8x8xf32> to vector<8xf32>
    %145 = vector.shape_cast %144 : vector<8xf32> to vector<1x8xf32>
    %146 = vector.extract_strided_slice %1 {offsets = [216, 0], sizes = [8, 8], strides = [1, 1]} : vector<256x8xf32> to vector<8x8xf32>
    %cst_43 = arith.constant dense<0xFF800000> : vector<8xf32>
    %147 = vector.multi_reduction <maximumf>, %146, %cst_43 [0] : vector<8x8xf32> to vector<8xf32>
    %148 = vector.shape_cast %147 : vector<8xf32> to vector<1x8xf32>
    %149 = vector.extract_strided_slice %1 {offsets = [224, 0], sizes = [8, 8], strides = [1, 1]} : vector<256x8xf32> to vector<8x8xf32>
    %cst_44 = arith.constant dense<0xFF800000> : vector<8xf32>
    %150 = vector.multi_reduction <maximumf>, %149, %cst_44 [0] : vector<8x8xf32> to vector<8xf32>
    %151 = vector.shape_cast %150 : vector<8xf32> to vector<1x8xf32>
    %152 = vector.extract_strided_slice %1 {offsets = [232, 0], sizes = [8, 8], strides = [1, 1]} : vector<256x8xf32> to vector<8x8xf32>
    %cst_45 = arith.constant dense<0xFF800000> : vector<8xf32>
    %153 = vector.multi_reduction <maximumf>, %152, %cst_45 [0] : vector<8x8xf32> to vector<8xf32>
    %154 = vector.shape_cast %153 : vector<8xf32> to vector<1x8xf32>
    %155 = vector.extract_strided_slice %1 {offsets = [240, 0], sizes = [8, 8], strides = [1, 1]} : vector<256x8xf32> to vector<8x8xf32>
    %cst_46 = arith.constant dense<0xFF800000> : vector<8xf32>
    %156 = vector.multi_reduction <maximumf>, %155, %cst_46 [0] : vector<8x8xf32> to vector<8xf32>
    %157 = vector.shape_cast %156 : vector<8xf32> to vector<1x8xf32>
    %158 = vector.extract_strided_slice %1 {offsets = [248, 0], sizes = [8, 8], strides = [1, 1]} : vector<256x8xf32> to vector<8x8xf32>
    %cst_47 = arith.constant dense<0xFF800000> : vector<8xf32>
    %159 = vector.multi_reduction <maximumf>, %158, %cst_47 [0] : vector<8x8xf32> to vector<8xf32>
    %160 = vector.shape_cast %159 : vector<8xf32> to vector<1x8xf32>
    %161 = arith.maximumf %67, %73 : vector<1x8xf32>
    %162 = arith.maximumf %161, %79 : vector<1x8xf32>
    %163 = arith.maximumf %162, %85 : vector<1x8xf32>
    %164 = arith.maximumf %163, %91 : vector<1x8xf32>
    %165 = arith.maximumf %164, %97 : vector<1x8xf32>
    %166 = arith.maximumf %165, %103 : vector<1x8xf32>
    %167 = arith.maximumf %166, %109 : vector<1x8xf32>
    %168 = arith.maximumf %70, %76 : vector<1x8xf32>
    %169 = arith.maximumf %168, %82 : vector<1x8xf32>
    %170 = arith.maximumf %169, %88 : vector<1x8xf32>
    %171 = arith.maximumf %170, %94 : vector<1x8xf32>
    %172 = arith.maximumf %171, %100 : vector<1x8xf32>
    %173 = arith.maximumf %172, %106 : vector<1x8xf32>
    %174 = arith.maximumf %173, %112 : vector<1x8xf32>
    %175 = arith.maximumf %115, %121 : vector<1x8xf32>
    %176 = arith.maximumf %175, %127 : vector<1x8xf32>
    %177 = arith.maximumf %176, %133 : vector<1x8xf32>
    %178 = arith.maximumf %177, %139 : vector<1x8xf32>
    %179 = arith.maximumf %178, %145 : vector<1x8xf32>
    %180 = arith.maximumf %179, %151 : vector<1x8xf32>
    %181 = arith.maximumf %180, %157 : vector<1x8xf32>
    %182 = arith.maximumf %118, %124 : vector<1x8xf32>
    %183 = arith.maximumf %182, %130 : vector<1x8xf32>
    %184 = arith.maximumf %183, %136 : vector<1x8xf32>
    %185 = arith.maximumf %184, %142 : vector<1x8xf32>
    %186 = arith.maximumf %185, %148 : vector<1x8xf32>
    %187 = arith.maximumf %186, %154 : vector<1x8xf32>
    %188 = arith.maximumf %187, %160 : vector<1x8xf32>
    %189 = vector.extract_strided_slice %1 {offsets = [0, 0], sizes = [5, 8], strides = [1, 1]} : vector<256x8xf32> to vector<5x8xf32>
    %cst_48 = arith.constant dense<0xFF800000> : vector<8xf32>
    %190 = vector.multi_reduction <maximumf>, %189, %cst_48 [0] : vector<5x8xf32> to vector<8xf32>
    %191 = vector.shape_cast %190 : vector<8xf32> to vector<1x8xf32>
    %192 = vector.extract_strided_slice %1 {offsets = [5, 0], sizes = [6, 8], strides = [1, 1]} : vector<256x8xf32> to vector<6x8xf32>
    %cst_49 = arith.constant dense<0xFF800000> : vector<8xf32>
    %193 = vector.multi_reduction <maximumf>, %192, %cst_49 [0] : vector<6x8xf32> to vector<8xf32>
    %194 = vector.shape_cast %193 : vector<8xf32> to vector<1x8xf32>
    %195 = vector.extract_strided_slice %1 {offsets = [11, 0], sizes = [5, 8], strides = [1, 1]} : vector<256x8xf32> to vector<5x8xf32>
    %cst_50 = arith.constant dense<0xFF800000> : vector<8xf32>
    %196 = vector.multi_reduction <maximumf>, %195, %cst_50 [0] : vector<5x8xf32> to vector<8xf32>
    %197 = vector.shape_cast %196 : vector<8xf32> to vector<1x8xf32>
    %198 = vector.extract_strided_slice %1 {offsets = [16, 0], sizes = [5, 8], strides = [1, 1]} : vector<256x8xf32> to vector<5x8xf32>
    %cst_51 = arith.constant dense<0xFF800000> : vector<8xf32>
    %199 = vector.multi_reduction <maximumf>, %198, %cst_51 [0] : vector<5x8xf32> to vector<8xf32>
    %200 = vector.shape_cast %199 : vector<8xf32> to vector<1x8xf32>
    %201 = vector.extract_strided_slice %1 {offsets = [21, 0], sizes = [6, 8], strides = [1, 1]} : vector<256x8xf32> to vector<6x8xf32>
    %cst_52 = arith.constant dense<0xFF800000> : vector<8xf32>
    %202 = vector.multi_reduction <maximumf>, %201, %cst_52 [0] : vector<6x8xf32> to vector<8xf32>
    %203 = vector.shape_cast %202 : vector<8xf32> to vector<1x8xf32>
    %204 = vector.extract_strided_slice %1 {offsets = [27, 0], sizes = [5, 8], strides = [1, 1]} : vector<256x8xf32> to vector<5x8xf32>
    %cst_53 = arith.constant dense<0xFF800000> : vector<8xf32>
    %205 = vector.multi_reduction <maximumf>, %204, %cst_53 [0] : vector<5x8xf32> to vector<8xf32>
    %206 = vector.shape_cast %205 : vector<8xf32> to vector<1x8xf32>
    %207 = vector.extract_strided_slice %1 {offsets = [32, 0], sizes = [5, 8], strides = [1, 1]} : vector<256x8xf32> to vector<5x8xf32>
    %cst_54 = arith.constant dense<0xFF800000> : vector<8xf32>
    %208 = vector.multi_reduction <maximumf>, %207, %cst_54 [0] : vector<5x8xf32> to vector<8xf32>
    %209 = vector.shape_cast %208 : vector<8xf32> to vector<1x8xf32>
    %210 = vector.extract_strided_slice %1 {offsets = [37, 0], sizes = [6, 8], strides = [1, 1]} : vector<256x8xf32> to vector<6x8xf32>
    %cst_55 = arith.constant dense<0xFF800000> : vector<8xf32>
    %211 = vector.multi_reduction <maximumf>, %210, %cst_55 [0] : vector<6x8xf32> to vector<8xf32>
    %212 = vector.shape_cast %211 : vector<8xf32> to vector<1x8xf32>
    %213 = vector.extract_strided_slice %1 {offsets = [43, 0], sizes = [5, 8], strides = [1, 1]} : vector<256x8xf32> to vector<5x8xf32>
    %cst_56 = arith.constant dense<0xFF800000> : vector<8xf32>
    %214 = vector.multi_reduction <maximumf>, %213, %cst_56 [0] : vector<5x8xf32> to vector<8xf32>
    %215 = vector.shape_cast %214 : vector<8xf32> to vector<1x8xf32>
    %216 = vector.extract_strided_slice %1 {offsets = [48, 0], sizes = [5, 8], strides = [1, 1]} : vector<256x8xf32> to vector<5x8xf32>
    %cst_57 = arith.constant dense<0xFF800000> : vector<8xf32>
    %217 = vector.multi_reduction <maximumf>, %216, %cst_57 [0] : vector<5x8xf32> to vector<8xf32>
    %218 = vector.shape_cast %217 : vector<8xf32> to vector<1x8xf32>
    %219 = vector.extract_strided_slice %1 {offsets = [53, 0], sizes = [6, 8], strides = [1, 1]} : vector<256x8xf32> to vector<6x8xf32>
    %cst_58 = arith.constant dense<0xFF800000> : vector<8xf32>
    %220 = vector.multi_reduction <maximumf>, %219, %cst_58 [0] : vector<6x8xf32> to vector<8xf32>
    %221 = vector.shape_cast %220 : vector<8xf32> to vector<1x8xf32>
    %222 = vector.extract_strided_slice %1 {offsets = [59, 0], sizes = [5, 8], strides = [1, 1]} : vector<256x8xf32> to vector<5x8xf32>
    %cst_59 = arith.constant dense<0xFF800000> : vector<8xf32>
    %223 = vector.multi_reduction <maximumf>, %222, %cst_59 [0] : vector<5x8xf32> to vector<8xf32>
    %224 = vector.shape_cast %223 : vector<8xf32> to vector<1x8xf32>
    %225 = vector.extract_strided_slice %1 {offsets = [64, 0], sizes = [5, 8], strides = [1, 1]} : vector<256x8xf32> to vector<5x8xf32>
    %cst_60 = arith.constant dense<0xFF800000> : vector<8xf32>
    %226 = vector.multi_reduction <maximumf>, %225, %cst_60 [0] : vector<5x8xf32> to vector<8xf32>
    %227 = vector.shape_cast %226 : vector<8xf32> to vector<1x8xf32>
    %228 = vector.extract_strided_slice %1 {offsets = [69, 0], sizes = [6, 8], strides = [1, 1]} : vector<256x8xf32> to vector<6x8xf32>
    %cst_61 = arith.constant dense<0xFF800000> : vector<8xf32>
    %229 = vector.multi_reduction <maximumf>, %228, %cst_61 [0] : vector<6x8xf32> to vector<8xf32>
    %230 = vector.shape_cast %229 : vector<8xf32> to vector<1x8xf32>
    %231 = vector.extract_strided_slice %1 {offsets = [75, 0], sizes = [5, 8], strides = [1, 1]} : vector<256x8xf32> to vector<5x8xf32>
    %cst_62 = arith.constant dense<0xFF800000> : vector<8xf32>
    %232 = vector.multi_reduction <maximumf>, %231, %cst_62 [0] : vector<5x8xf32> to vector<8xf32>
    %233 = vector.shape_cast %232 : vector<8xf32> to vector<1x8xf32>
    %234 = vector.extract_strided_slice %1 {offsets = [80, 0], sizes = [5, 8], strides = [1, 1]} : vector<256x8xf32> to vector<5x8xf32>
    %cst_63 = arith.constant dense<0xFF800000> : vector<8xf32>
    %235 = vector.multi_reduction <maximumf>, %234, %cst_63 [0] : vector<5x8xf32> to vector<8xf32>
    %236 = vector.shape_cast %235 : vector<8xf32> to vector<1x8xf32>
    %237 = vector.extract_strided_slice %1 {offsets = [85, 0], sizes = [6, 8], strides = [1, 1]} : vector<256x8xf32> to vector<6x8xf32>
    %cst_64 = arith.constant dense<0xFF800000> : vector<8xf32>
    %238 = vector.multi_reduction <maximumf>, %237, %cst_64 [0] : vector<6x8xf32> to vector<8xf32>
    %239 = vector.shape_cast %238 : vector<8xf32> to vector<1x8xf32>
    %240 = vector.extract_strided_slice %1 {offsets = [91, 0], sizes = [5, 8], strides = [1, 1]} : vector<256x8xf32> to vector<5x8xf32>
    %cst_65 = arith.constant dense<0xFF800000> : vector<8xf32>
    %241 = vector.multi_reduction <maximumf>, %240, %cst_65 [0] : vector<5x8xf32> to vector<8xf32>
    %242 = vector.shape_cast %241 : vector<8xf32> to vector<1x8xf32>
    %243 = vector.extract_strided_slice %1 {offsets = [96, 0], sizes = [5, 8], strides = [1, 1]} : vector<256x8xf32> to vector<5x8xf32>
    %cst_66 = arith.constant dense<0xFF800000> : vector<8xf32>
    %244 = vector.multi_reduction <maximumf>, %243, %cst_66 [0] : vector<5x8xf32> to vector<8xf32>
    %245 = vector.shape_cast %244 : vector<8xf32> to vector<1x8xf32>
    %246 = vector.extract_strided_slice %1 {offsets = [101, 0], sizes = [6, 8], strides = [1, 1]} : vector<256x8xf32> to vector<6x8xf32>
    %cst_67 = arith.constant dense<0xFF800000> : vector<8xf32>
    %247 = vector.multi_reduction <maximumf>, %246, %cst_67 [0] : vector<6x8xf32> to vector<8xf32>
    %248 = vector.shape_cast %247 : vector<8xf32> to vector<1x8xf32>
    %249 = vector.extract_strided_slice %1 {offsets = [107, 0], sizes = [5, 8], strides = [1, 1]} : vector<256x8xf32> to vector<5x8xf32>
    %cst_68 = arith.constant dense<0xFF800000> : vector<8xf32>
    %250 = vector.multi_reduction <maximumf>, %249, %cst_68 [0] : vector<5x8xf32> to vector<8xf32>
    %251 = vector.shape_cast %250 : vector<8xf32> to vector<1x8xf32>
    %252 = vector.extract_strided_slice %1 {offsets = [112, 0], sizes = [5, 8], strides = [1, 1]} : vector<256x8xf32> to vector<5x8xf32>
    %cst_69 = arith.constant dense<0xFF800000> : vector<8xf32>
    %253 = vector.multi_reduction <maximumf>, %252, %cst_69 [0] : vector<5x8xf32> to vector<8xf32>
    %254 = vector.shape_cast %253 : vector<8xf32> to vector<1x8xf32>
    %255 = vector.extract_strided_slice %1 {offsets = [117, 0], sizes = [6, 8], strides = [1, 1]} : vector<256x8xf32> to vector<6x8xf32>
    %cst_70 = arith.constant dense<0xFF800000> : vector<8xf32>
    %256 = vector.multi_reduction <maximumf>, %255, %cst_70 [0] : vector<6x8xf32> to vector<8xf32>
    %257 = vector.shape_cast %256 : vector<8xf32> to vector<1x8xf32>
    %258 = vector.extract_strided_slice %1 {offsets = [123, 0], sizes = [5, 8], strides = [1, 1]} : vector<256x8xf32> to vector<5x8xf32>
    %cst_71 = arith.constant dense<0xFF800000> : vector<8xf32>
    %259 = vector.multi_reduction <maximumf>, %258, %cst_71 [0] : vector<5x8xf32> to vector<8xf32>
    %260 = vector.shape_cast %259 : vector<8xf32> to vector<1x8xf32>
    %261 = vector.extract_strided_slice %1 {offsets = [128, 0], sizes = [5, 8], strides = [1, 1]} : vector<256x8xf32> to vector<5x8xf32>
    %cst_72 = arith.constant dense<0xFF800000> : vector<8xf32>
    %262 = vector.multi_reduction <maximumf>, %261, %cst_72 [0] : vector<5x8xf32> to vector<8xf32>
    %263 = vector.shape_cast %262 : vector<8xf32> to vector<1x8xf32>
    %264 = vector.extract_strided_slice %1 {offsets = [133, 0], sizes = [6, 8], strides = [1, 1]} : vector<256x8xf32> to vector<6x8xf32>
    %cst_73 = arith.constant dense<0xFF800000> : vector<8xf32>
    %265 = vector.multi_reduction <maximumf>, %264, %cst_73 [0] : vector<6x8xf32> to vector<8xf32>
    %266 = vector.shape_cast %265 : vector<8xf32> to vector<1x8xf32>
    %267 = vector.extract_strided_slice %1 {offsets = [139, 0], sizes = [5, 8], strides = [1, 1]} : vector<256x8xf32> to vector<5x8xf32>
    %cst_74 = arith.constant dense<0xFF800000> : vector<8xf32>
    %268 = vector.multi_reduction <maximumf>, %267, %cst_74 [0] : vector<5x8xf32> to vector<8xf32>
    %269 = vector.shape_cast %268 : vector<8xf32> to vector<1x8xf32>
    %270 = vector.extract_strided_slice %1 {offsets = [144, 0], sizes = [5, 8], strides = [1, 1]} : vector<256x8xf32> to vector<5x8xf32>
    %cst_75 = arith.constant dense<0xFF800000> : vector<8xf32>
    %271 = vector.multi_reduction <maximumf>, %270, %cst_75 [0] : vector<5x8xf32> to vector<8xf32>
    %272 = vector.shape_cast %271 : vector<8xf32> to vector<1x8xf32>
    %273 = vector.extract_strided_slice %1 {offsets = [149, 0], sizes = [6, 8], strides = [1, 1]} : vector<256x8xf32> to vector<6x8xf32>
    %cst_76 = arith.constant dense<0xFF800000> : vector<8xf32>
    %274 = vector.multi_reduction <maximumf>, %273, %cst_76 [0] : vector<6x8xf32> to vector<8xf32>
    %275 = vector.shape_cast %274 : vector<8xf32> to vector<1x8xf32>
    %276 = vector.extract_strided_slice %1 {offsets = [155, 0], sizes = [5, 8], strides = [1, 1]} : vector<256x8xf32> to vector<5x8xf32>
    %cst_77 = arith.constant dense<0xFF800000> : vector<8xf32>
    %277 = vector.multi_reduction <maximumf>, %276, %cst_77 [0] : vector<5x8xf32> to vector<8xf32>
    %278 = vector.shape_cast %277 : vector<8xf32> to vector<1x8xf32>
    %279 = vector.extract_strided_slice %1 {offsets = [160, 0], sizes = [5, 8], strides = [1, 1]} : vector<256x8xf32> to vector<5x8xf32>
    %cst_78 = arith.constant dense<0xFF800000> : vector<8xf32>
    %280 = vector.multi_reduction <maximumf>, %279, %cst_78 [0] : vector<5x8xf32> to vector<8xf32>
    %281 = vector.shape_cast %280 : vector<8xf32> to vector<1x8xf32>
    %282 = vector.extract_strided_slice %1 {offsets = [165, 0], sizes = [6, 8], strides = [1, 1]} : vector<256x8xf32> to vector<6x8xf32>
    %cst_79 = arith.constant dense<0xFF800000> : vector<8xf32>
    %283 = vector.multi_reduction <maximumf>, %282, %cst_79 [0] : vector<6x8xf32> to vector<8xf32>
    %284 = vector.shape_cast %283 : vector<8xf32> to vector<1x8xf32>
    %285 = vector.extract_strided_slice %1 {offsets = [171, 0], sizes = [5, 8], strides = [1, 1]} : vector<256x8xf32> to vector<5x8xf32>
    %cst_80 = arith.constant dense<0xFF800000> : vector<8xf32>
    %286 = vector.multi_reduction <maximumf>, %285, %cst_80 [0] : vector<5x8xf32> to vector<8xf32>
    %287 = vector.shape_cast %286 : vector<8xf32> to vector<1x8xf32>
    %288 = vector.extract_strided_slice %1 {offsets = [176, 0], sizes = [5, 8], strides = [1, 1]} : vector<256x8xf32> to vector<5x8xf32>
    %cst_81 = arith.constant dense<0xFF800000> : vector<8xf32>
    %289 = vector.multi_reduction <maximumf>, %288, %cst_81 [0] : vector<5x8xf32> to vector<8xf32>
    %290 = vector.shape_cast %289 : vector<8xf32> to vector<1x8xf32>
    %291 = vector.extract_strided_slice %1 {offsets = [181, 0], sizes = [6, 8], strides = [1, 1]} : vector<256x8xf32> to vector<6x8xf32>
    %cst_82 = arith.constant dense<0xFF800000> : vector<8xf32>
    %292 = vector.multi_reduction <maximumf>, %291, %cst_82 [0] : vector<6x8xf32> to vector<8xf32>
    %293 = vector.shape_cast %292 : vector<8xf32> to vector<1x8xf32>
    %294 = vector.extract_strided_slice %1 {offsets = [187, 0], sizes = [5, 8], strides = [1, 1]} : vector<256x8xf32> to vector<5x8xf32>
    %cst_83 = arith.constant dense<0xFF800000> : vector<8xf32>
    %295 = vector.multi_reduction <maximumf>, %294, %cst_83 [0] : vector<5x8xf32> to vector<8xf32>
    %296 = vector.shape_cast %295 : vector<8xf32> to vector<1x8xf32>
    %297 = vector.extract_strided_slice %1 {offsets = [192, 0], sizes = [5, 8], strides = [1, 1]} : vector<256x8xf32> to vector<5x8xf32>
    %cst_84 = arith.constant dense<0xFF800000> : vector<8xf32>
    %298 = vector.multi_reduction <maximumf>, %297, %cst_84 [0] : vector<5x8xf32> to vector<8xf32>
    %299 = vector.shape_cast %298 : vector<8xf32> to vector<1x8xf32>
    %300 = vector.extract_strided_slice %1 {offsets = [197, 0], sizes = [6, 8], strides = [1, 1]} : vector<256x8xf32> to vector<6x8xf32>
    %cst_85 = arith.constant dense<0xFF800000> : vector<8xf32>
    %301 = vector.multi_reduction <maximumf>, %300, %cst_85 [0] : vector<6x8xf32> to vector<8xf32>
    %302 = vector.shape_cast %301 : vector<8xf32> to vector<1x8xf32>
    %303 = vector.extract_strided_slice %1 {offsets = [203, 0], sizes = [5, 8], strides = [1, 1]} : vector<256x8xf32> to vector<5x8xf32>
    %cst_86 = arith.constant dense<0xFF800000> : vector<8xf32>
    %304 = vector.multi_reduction <maximumf>, %303, %cst_86 [0] : vector<5x8xf32> to vector<8xf32>
    %305 = vector.shape_cast %304 : vector<8xf32> to vector<1x8xf32>
    %306 = vector.extract_strided_slice %1 {offsets = [208, 0], sizes = [5, 8], strides = [1, 1]} : vector<256x8xf32> to vector<5x8xf32>
    %cst_87 = arith.constant dense<0xFF800000> : vector<8xf32>
    %307 = vector.multi_reduction <maximumf>, %306, %cst_87 [0] : vector<5x8xf32> to vector<8xf32>
    %308 = vector.shape_cast %307 : vector<8xf32> to vector<1x8xf32>
    %309 = vector.extract_strided_slice %1 {offsets = [213, 0], sizes = [6, 8], strides = [1, 1]} : vector<256x8xf32> to vector<6x8xf32>
    %cst_88 = arith.constant dense<0xFF800000> : vector<8xf32>
    %310 = vector.multi_reduction <maximumf>, %309, %cst_88 [0] : vector<6x8xf32> to vector<8xf32>
    %311 = vector.shape_cast %310 : vector<8xf32> to vector<1x8xf32>
    %312 = vector.extract_strided_slice %1 {offsets = [219, 0], sizes = [5, 8], strides = [1, 1]} : vector<256x8xf32> to vector<5x8xf32>
    %cst_89 = arith.constant dense<0xFF800000> : vector<8xf32>
    %313 = vector.multi_reduction <maximumf>, %312, %cst_89 [0] : vector<5x8xf32> to vector<8xf32>
    %314 = vector.shape_cast %313 : vector<8xf32> to vector<1x8xf32>
    %315 = vector.extract_strided_slice %1 {offsets = [224, 0], sizes = [5, 8], strides = [1, 1]} : vector<256x8xf32> to vector<5x8xf32>
    %cst_90 = arith.constant dense<0xFF800000> : vector<8xf32>
    %316 = vector.multi_reduction <maximumf>, %315, %cst_90 [0] : vector<5x8xf32> to vector<8xf32>
    %317 = vector.shape_cast %316 : vector<8xf32> to vector<1x8xf32>
    %318 = vector.extract_strided_slice %1 {offsets = [229, 0], sizes = [6, 8], strides = [1, 1]} : vector<256x8xf32> to vector<6x8xf32>
    %cst_91 = arith.constant dense<0xFF800000> : vector<8xf32>
    %319 = vector.multi_reduction <maximumf>, %318, %cst_91 [0] : vector<6x8xf32> to vector<8xf32>
    %320 = vector.shape_cast %319 : vector<8xf32> to vector<1x8xf32>
    %321 = vector.extract_strided_slice %1 {offsets = [235, 0], sizes = [5, 8], strides = [1, 1]} : vector<256x8xf32> to vector<5x8xf32>
    %cst_92 = arith.constant dense<0xFF800000> : vector<8xf32>
    %322 = vector.multi_reduction <maximumf>, %321, %cst_92 [0] : vector<5x8xf32> to vector<8xf32>
    %323 = vector.shape_cast %322 : vector<8xf32> to vector<1x8xf32>
    %324 = vector.extract_strided_slice %1 {offsets = [240, 0], sizes = [5, 8], strides = [1, 1]} : vector<256x8xf32> to vector<5x8xf32>
    %cst_93 = arith.constant dense<0xFF800000> : vector<8xf32>
    %325 = vector.multi_reduction <maximumf>, %324, %cst_93 [0] : vector<5x8xf32> to vector<8xf32>
    %326 = vector.shape_cast %325 : vector<8xf32> to vector<1x8xf32>
    %327 = vector.extract_strided_slice %1 {offsets = [245, 0], sizes = [6, 8], strides = [1, 1]} : vector<256x8xf32> to vector<6x8xf32>
    %cst_94 = arith.constant dense<0xFF800000> : vector<8xf32>
    %328 = vector.multi_reduction <maximumf>, %327, %cst_94 [0] : vector<6x8xf32> to vector<8xf32>
    %329 = vector.shape_cast %328 : vector<8xf32> to vector<1x8xf32>
    %330 = vector.extract_strided_slice %1 {offsets = [251, 0], sizes = [5, 8], strides = [1, 1]} : vector<256x8xf32> to vector<5x8xf32>
    %cst_95 = arith.constant dense<0xFF800000> : vector<8xf32>
    %331 = vector.multi_reduction <maximumf>, %330, %cst_95 [0] : vector<5x8xf32> to vector<8xf32>
    %332 = vector.shape_cast %331 : vector<8xf32> to vector<1x8xf32>
    %333 = arith.maximumf %191, %200 : vector<1x8xf32>
    %334 = arith.maximumf %333, %209 : vector<1x8xf32>
    %335 = arith.maximumf %334, %218 : vector<1x8xf32>
    %336 = arith.maximumf %335, %227 : vector<1x8xf32>
    %cst_96 = arith.constant 0.000000e+00 : f32
    %337 = vector.broadcast %cst_96 : f32 to vector<1x8xf32>
    %338 = arith.maximumf %336, %337 : vector<1x8xf32>
    %339 = arith.maximumf %194, %203 : vector<1x8xf32>
    %340 = arith.maximumf %339, %212 : vector<1x8xf32>
    %341 = arith.maximumf %340, %221 : vector<1x8xf32>
    %342 = arith.maximumf %341, %230 : vector<1x8xf32>
    %cst_97 = arith.constant 0.000000e+00 : f32
    %343 = vector.broadcast %cst_97 : f32 to vector<1x8xf32>
    %344 = arith.maximumf %342, %343 : vector<1x8xf32>
    %345 = arith.maximumf %197, %206 : vector<1x8xf32>
    %346 = arith.maximumf %345, %215 : vector<1x8xf32>
    %347 = arith.maximumf %346, %224 : vector<1x8xf32>
    %348 = arith.maximumf %347, %233 : vector<1x8xf32>
    %cst_98 = arith.constant 0.000000e+00 : f32
    %349 = vector.broadcast %cst_98 : f32 to vector<1x8xf32>
    %350 = arith.maximumf %348, %349 : vector<1x8xf32>
    %351 = arith.maximumf %236, %245 : vector<1x8xf32>
    %352 = arith.maximumf %351, %254 : vector<1x8xf32>
    %353 = arith.maximumf %352, %263 : vector<1x8xf32>
    %354 = arith.maximumf %353, %272 : vector<1x8xf32>
    %355 = arith.maximumf %354, %281 : vector<1x8xf32>
    %cst_99 = arith.constant 0.000000e+00 : f32
    %356 = vector.broadcast %cst_99 : f32 to vector<1x8xf32>
    %357 = arith.maximumf %355, %356 : vector<1x8xf32>
    %358 = arith.maximumf %239, %248 : vector<1x8xf32>
    %359 = arith.maximumf %358, %257 : vector<1x8xf32>
    %360 = arith.maximumf %359, %266 : vector<1x8xf32>
    %361 = arith.maximumf %360, %275 : vector<1x8xf32>
    %362 = arith.maximumf %361, %284 : vector<1x8xf32>
    %363 = arith.maximumf %242, %251 : vector<1x8xf32>
    %364 = arith.maximumf %363, %260 : vector<1x8xf32>
    %365 = arith.maximumf %364, %269 : vector<1x8xf32>
    %366 = arith.maximumf %365, %278 : vector<1x8xf32>
    %367 = arith.maximumf %366, %287 : vector<1x8xf32>
    %cst_100 = arith.constant 0.000000e+00 : f32
    %368 = vector.broadcast %cst_100 : f32 to vector<1x8xf32>
    %369 = arith.maximumf %367, %368 : vector<1x8xf32>
    %370 = arith.maximumf %290, %299 : vector<1x8xf32>
    %371 = arith.maximumf %370, %308 : vector<1x8xf32>
    %372 = arith.maximumf %371, %317 : vector<1x8xf32>
    %373 = arith.maximumf %372, %326 : vector<1x8xf32>
    %cst_101 = arith.constant 0.000000e+00 : f32
    %374 = vector.broadcast %cst_101 : f32 to vector<1x8xf32>
    %375 = arith.maximumf %373, %374 : vector<1x8xf32>
    %376 = arith.maximumf %293, %302 : vector<1x8xf32>
    %377 = arith.maximumf %376, %311 : vector<1x8xf32>
    %378 = arith.maximumf %377, %320 : vector<1x8xf32>
    %379 = arith.maximumf %378, %329 : vector<1x8xf32>
    %cst_102 = arith.constant 0.000000e+00 : f32
    %380 = vector.broadcast %cst_102 : f32 to vector<1x8xf32>
    %381 = arith.maximumf %379, %380 : vector<1x8xf32>
    %382 = arith.maximumf %296, %305 : vector<1x8xf32>
    %383 = arith.maximumf %382, %314 : vector<1x8xf32>
    %384 = arith.maximumf %383, %323 : vector<1x8xf32>
    %385 = arith.maximumf %384, %332 : vector<1x8xf32>
    %cst_103 = arith.constant 0.000000e+00 : f32
    %386 = vector.broadcast %cst_103 : f32 to vector<1x8xf32>
    %387 = arith.maximumf %385, %386 : vector<1x8xf32>
    %388 = tpu.concatenate %64, %167, %174, %181, %188, %338, %344, %350, %357, %362, %369, %375, %381, %387 in 0 : vector<1x8xf32>, vector<1x8xf32>, vector<1x8xf32>, vector<1x8xf32>, vector<1x8xf32>, vector<1x8xf32>, vector<1x8xf32>, vector<1x8xf32>, vector<1x8xf32>, vector<1x8xf32>, vector<1x8xf32>, vector<1x8xf32>, vector<1x8xf32>, vector<1x8xf32> -> vector<14x8xf32>
    %c0_104 = arith.constant 0 : index
    %c0_105 = arith.constant 0 : index
    %389 = vector.load %arg2[%c0_104, %c0_105] : memref<14x8xf32, #tpu.memory_space<vmem>>, vector<14x8xf32>
    tpu.vector_store %arg2[%c0_104, %c0_105], %388 {strides = array<i32>} : memref<14x8xf32, #tpu.memory_space<vmem>>, vector<14x8xf32>,
    return
  }
  func.func @transform_0(%arg0: i32) -> (i32, i32) {
    %c0_i32 = arith.constant 0 : i32
    %c0_i32_0 = arith.constant 0 : i32
    return %arg0, %c0_i32 : i32, i32
  }
  func.func @transform_1(%arg0: i32) -> (i32, i32) {
    %c0_i32 = arith.constant 0 : i32
    %c0_i32_0 = arith.constant 0 : i32
    return %c0_i32, %arg0 : i32, i32
  }
}

</mosaic_0001>

<bundles_post_ra>
// kernel: tpu_custom_call.1
= control target key start
LH: loop header
LB: loop body
LE: loop exit
PB: predicated region body
PF: predicated region fallthrough
CT: control target
= control target key end

     0   :  { %6 = vsyncpa [#allocation3], 0  ;;  %s938_s6 = smov [#allocation2]   ;;  %s1299_s0 = inlined_call_operand.hbm [shape: f32[8,256], index: 0, kind: input, shape index: {}]   ;;  %s1300_s1 = inlined_call_operand.vmem [shape: f32[14,8], index: 1, kind: output, shape index: {}]  }
   0x1   :  { %s13_s7 = sshll.u32 %s938_s6, 4  ;;  %s914_s10 = scalar_lea.hbm %s1299_s0, 256  ;;  %s14_s7 = int_to_ptr.vmem [resolvable:$true] %s13_s7 }
   0x2   :  { %p915_p0 = scmp.ne.s32.totalorder %s1299_s0, %s914_s10  ;;  %p918_p1 = scmp.lt.u32.totalorder %s914_s10, %s1299_s0 }
   0x4   :  { %p920_p2 = pnand %p918_p1, %p915_p0 }
   0x6   :  { %923 = shalt.err (!%p920_p2)
}
   0x7   :  { %s924_s15 = scalar_lea.vmem %s14_s7, 256  ;;  %p929_p4 = scmp.lt.s32.totalorder %s14_s7, %s14_s7 }
   0x8   :  { %p925_p3 = scmp.ne.s32.totalorder %s14_s7, %s924_s15  ;;  %p930_p5 = scmp.lt.s32.totalorder %s924_s15, %s924_s15 }
   0xa   :  { %p931_p6 = por %p930_p5, %p929_p4 }
   0xc   :  { %p932_p7 = pnand %p931_p6, %p925_p3 }
   0xe   :  { %935 = shalt.err (!%p932_p7)
}
   0xf   :  { %16 = dma.hbm_to_vmem [thread:$0]  %s1299_s0, 256, %s14_s7, [#allocation3]  }
  0x10   :  { %936 = dma.done.wait [#allocation3], 256  }
  0x11   :  { %937 = vsyncadd [#allocation3], 4294967040  ;;  %v20_v0 = vld [vmem:[#allocation2] sm:$0xff]  ;;  %v21_v1 = vld [vmem:[#allocation2 + $0x8] sm:$0xff]  ;;  %vm86_vm0 = vcmask 64512   ;;  %vm466_vm1 = vcmask 61440  }
  0x12   :  { %22 = vxpose.xlu0.b32.start.end [1/1] (short) %v20_v0, 128  ;;  %vm474_vm2 = vcmask 64517   ;;  %vm476_vm3 = vcmask 59392   ;;  %vm485_vm4 = vcmask 64515   ;;  %vm885_vm5 = vcmask 1040384  }
  0x13   :  { %vm887_vm6 = vcmask 1041408   ;;  %vm889_vm7 = vcmask 1042432   ;;  %vm891_vm8 = vcmask 1043456   ;;  %vm893_vm9 = vcmask 1044480  }
  0x14   :  { %vm895_vm10 = vcmask 1045504   ;;  %vm897_vm11 = vcmask 1046528   ;;  %vm905_vm12 = vcmask 62464  }
  0x4f   :  { %54 = vxpose.xlu0.b32.start.end [1/1] (short) %v21_v1, 128 }
  0x92   :  { %v38_v2 = vpop.trf.xlu0 }
  0x93   :  { %v87_v3 = vsel %vm86_vm0, %v38_v2, -inf  ;;  %v467_v4 = vsel %vm466_vm1, %v38_v2, -inf  ;;  %v475_v10 = vsel %vm474_vm2, %v38_v2, -inf }
  0x94   :  { %v246_v5 = vrot.slane %v87_v3, 4  ;;  %v468_v6 = vrot.slane %v467_v4, 4 }
  0x96   :  { %v247_v7 = vmax.f32 %v87_v3, %v246_v5  ;;  %v469_v8 = vmax.f32 %v467_v4, %v468_v6  ;;  %v39_v9 = vpop.trf.xlu0 }
  0x97   :  { %v88_v11 = vsel %vm86_vm0, %v39_v9, -inf  ;;  %v477_v12 = vsel %vm476_vm3, %v39_v9, -inf  ;;  %v486_v13 = vsel %vm485_vm4, %v39_v9, -inf }
  0x98   :  { %v248_v14 = vrot.slane %v247_v7, 2  ;;  %v470_v15 = vrot.slane %v469_v8, 2  ;;  %v89_v16 = vmax.f32 %v87_v3, %v88_v11  ;;  %v252_v17 = vrot.slane %v88_v11, 4 }
  0x99   :  { %v478_v18 = vmax.f32 %v475_v10, %v477_v12  ;;  %v487_v19 = vrot.slane %v486_v13, 4 }
  0x9a   :  { %v249_v20 = vmax.f32 %v247_v7, %v248_v14  ;;  %v471_v21 = vmax.f32 %v469_v8, %v470_v15  ;;  %v90_v22 = vrot.slane %v89_v16, 4  ;;  %v253_v23 = vmax.f32 %v88_v11, %v252_v17  ;;  %v40_v24 = vpop.trf.xlu0 }
  0x9b   :  { %v479_v25 = vrot.slane %v478_v18, 4  ;;  %v488_v26 = vmax.f32 %v486_v13, %v487_v19  ;;  %v96_v27 = vsel %vm86_vm0, %v40_v24, -inf  ;;  %v493_v28 = vsel %vm466_vm1, %v40_v24, -inf }
  0x9c   :  { %v250_v29 = vrot.slane %v249_v20, 1  ;;  %v472_v30 = vrot.slane %v471_v21, 1  ;;  %v91_v31 = vmax.f32 %v89_v16, %v90_v22  ;;  %v254_v32 = vrot.slane %v253_v23, 2 }
  0x9d   :  { %v480_v33 = vmax.f32 %v478_v18, %v479_v25  ;;  %v489_v34 = vrot.slane %v488_v26, 2  ;;  %v258_v35 = vrot.slane %v96_v27, 4  ;;  %v494_v36 = vrot.slane %v493_v28, 4 }
  0x9e   :  { %v969_v37 = vmax.f32 %v249_v20, %v250_v29  ;;  %v971_v38 = vmax.f32 %v471_v21, %v472_v30  ;;  %v92_v39 = vrot.slane %v91_v31, 2  ;;  %v255_v40 = vmax.f32 %v253_v23, %v254_v32  ;;  %v41_v41 = vpop.trf.xlu0 }
  0x9f   :  { %v481_v42 = vrot.slane %v480_v33, 2  ;;  %v490_v43 = vmax.f32 %v488_v26, %v489_v34  ;;  %v259_v44 = vmax.f32 %v96_v27, %v258_v35  ;;  %v495_v45 = vmax.f32 %v493_v28, %v494_v36 }
  0xa0   :  { %v93_v46 = vmax.f32 %v91_v31, %v92_v39  ;;  %v256_v47 = vrot.slane %v255_v40, 1  ;;  %v500_v48 = vsel %vm474_vm2, %v40_v24, -inf  ;;  %v97_v49 = vsel %vm86_vm0, %v41_v41, -inf }
  0xa1   :  { %v482_v50 = vmax.f32 %v480_v33, %v481_v42  ;;  %v491_v51 = vrot.slane %v490_v43, 1  ;;  %v260_v52 = vrot.slane %v259_v44, 2  ;;  %v496_v53 = vrot.slane %v495_v45, 2 }
  0xa2   :  { %v94_v54 = vrot.slane %v93_v46, 1  ;;  %v975_v55 = vmax.f32 %v255_v40, %v256_v47  ;;  %v98_v56 = vmax.f32 %v96_v27, %v97_v49  ;;  %v264_v57 = vrot.slane %v97_v49, 4  ;;  %v42_v58 = vpop.trf.xlu0 }
  0xa3   :  { %v483_v59 = vrot.slane %v482_v50, 1  ;;  %v977_v60 = vmax.f32 %v490_v43, %v491_v51  ;;  %v261_v61 = vmax.f32 %v259_v44, %v260_v52  ;;  %v497_v62 = vmax.f32 %v495_v45, %v496_v53 }
  0xa4   :  { %v979_v63 = vmax.f32 %v93_v46, %v94_v54  ;;  %v99_v0 = vrot.slane %v98_v56, 4  ;;  %v265_v1 = vmax.f32 %v97_v49, %v264_v57  ;;  %v501_v2 = vsel %vm476_vm3, %v41_v41, -inf }
  0xa5   :  { %v982_v3 = vmax.f32 %v482_v50, %v483_v59  ;;  %v262_v4 = vrot.slane %v261_v61, 1  ;;  %v498_v5 = vrot.slane %v497_v62, 1  ;;  %v502_v6 = vmax.f32 %v500_v48, %v501_v2 }
  0xa6   :  { %v100_v7 = vmax.f32 %v98_v56, %v99_v0  ;;  %v266_v8 = vrot.slane %v265_v1, 2  ;;  %v509_v9 = vsel %vm485_vm4, %v41_v41, -inf  ;;  %v105_v10 = vsel %vm86_vm0, %v42_v58, -inf  ;;  %v43_v19 = vpop.trf.xlu0 }
  0xa7   :  { %v263_v11 = vmax.f32 %v261_v61, %v262_v4  ;;  %v986_v12 = vmax.f32 %v497_v62, %v498_v5  ;;  %v503_v13 = vrot.slane %v502_v6, 4  ;;  %v510_v14 = vrot.slane %v509_v9, 4 }
  0xa8   :  { %v101_v15 = vrot.slane %v100_v7, 2  ;;  %v267_v16 = vmax.f32 %v265_v1, %v266_v8  ;;  %v270_v17 = vrot.slane %v105_v10, 4  ;;  %v516_v18 = vsel %vm466_vm1, %v42_v58, -inf }
  0xa9   :  { %v438_v20 = vmax.f32 %v969_v37, %v263_v11  ;;  %v838_v21 = vmax.f32 %v971_v38, %v986_v12  ;;  %v504_v22 = vmax.f32 %v502_v6, %v503_v13  ;;  %v511_v23 = vmax.f32 %v509_v9, %v510_v14 }
  0xaa   :  { %v102_v24 = vmax.f32 %v100_v7, %v101_v15  ;;  %v268_v25 = vrot.slane %v267_v16, 1  ;;  %v271_v26 = vmax.f32 %v105_v10, %v270_v17  ;;  %v517_v27 = vrot.slane %v516_v18, 4  ;;  %v44_v48 = vpop.trf.xlu0 }
  0xab   :  { %v505_v28 = vrot.slane %v504_v22, 2  ;;  %v512_v29 = vrot.slane %v511_v23, 2  ;;  %v523_v30 = vsel %vm474_vm2, %v42_v58, -inf  ;;  %v106_v31 = vsel %vm86_vm0, %v43_v19, -inf }
  0xac   :  { %v103_v32 = vrot.slane %v102_v24, 1  ;;  %v269_v33 = vmax.f32 %v267_v16, %v268_v25  ;;  %v272_v34 = vrot.slane %v271_v26, 2  ;;  %v518_v35 = vmax.f32 %v516_v18, %v517_v27 }
  0xad   :  { %v506_v36 = vmax.f32 %v504_v22, %v505_v28  ;;  %v513_v37 = vmax.f32 %v511_v23, %v512_v29  ;;  %v107_v39 = vmax.f32 %v105_v10, %v106_v31  ;;  %v276_v38 = vrot.slane %v106_v31, 4 }
  0xae   :  { %v104_v40 = vmax.f32 %v102_v24, %v103_v32  ;;  %v445_v41 = vmax.f32 %v975_v55, %v269_v33  ;;  %v273_v42 = vmax.f32 %v271_v26, %v272_v34  ;;  %v519_v43 = vrot.slane %v518_v35, 2  ;;  %v45_v11 = vpop.trf.xlu0 }
  0xaf   :  { %v507_v44 = vrot.slane %v506_v36, 1  ;;  %v514_v45 = vrot.slane %v513_v37, 1  ;;  %v108_v46 = vrot.slane %v107_v39, 4  ;;  %v277_v47 = vmax.f32 %v106_v31, %v276_v38 }
  0xb0   :  { %v231_v49 = vmax.f32 %v979_v63, %v104_v40  ;;  %v274_v50 = vrot.slane %v273_v42, 1  ;;  %v520_v51 = vmax.f32 %v518_v35, %v519_v43  ;;  %v524_v52 = vsel %vm476_vm3, %v43_v19, -inf }
  0xb1   :  { %v997_v53 = vmax.f32 %v506_v36, %v507_v44  ;;  %v999_v54 = vmax.f32 %v513_v37, %v514_v45  ;;  %v109_v56 = vmax.f32 %v107_v39, %v108_v46  ;;  %v278_v57 = vrot.slane %v277_v47, 2 }
  0xb2   :  { %v275_v55 = vmax.f32 %v273_v42, %v274_v50  ;;  %v521_v58 = vrot.slane %v520_v51, 1  ;;  %v525_v59 = vmax.f32 %v523_v30, %v524_v52  ;;  %v532_v61 = vsel %vm485_vm4, %v43_v19, -inf  ;;  %v46_v39 = vpop.trf.xlu0 }
  0xb3   :  { %v843_v62 = vmax.f32 %v982_v3, %v997_v53  ;;  %v848_v63 = vmax.f32 %v977_v60, %v999_v54  ;;  %v110_v0 = vrot.slane %v109_v56, 2  ;;  %v279_v1 = vmax.f32 %v277_v47, %v278_v57 }
  0xb4   :  { %v1006_v2 = vmax.f32 %v438_v20, %v275_v55  ;;  %v522_v4 = vmax.f32 %v520_v51, %v521_v58  ;;  %v526_v5 = vrot.slane %v525_v59, 4  ;;  %v533_v6 = vrot.slane %v532_v61, 4 }
  0xb5   :  { %v111_v7 = vmax.f32 %v109_v56, %v110_v0  ;;  %v280_v8 = vrot.slane %v279_v1, 1  ;;  %v114_v9 = vsel %vm86_vm0, %v44_v48, -inf  ;;  %v539_v10 = vsel %vm466_vm1, %v44_v48, -inf }
  0xb6   :  { %v1010_v12 = vmax.f32 %v838_v21, %v522_v4  ;;  %v527_v3 = vmax.f32 %v525_v59, %v526_v5  ;;  %v534_v13 = vmax.f32 %v532_v61, %v533_v6  ;;  %v282_v14 = vrot.slane %v114_v9, 4 }
  0xb7   :  { %v112_v60 = vrot.slane %v111_v7, 1  ;;  %v281_v15 = vmax.f32 %v279_v1, %v280_v8  ;;  %v540_v16 = vrot.slane %v539_v10, 4  ;;  %v546_v17 = vsel %vm474_vm2, %v44_v48, -inf }
  0xb8   :  { %v528_v18 = vrot.slane %v527_v3, 2  ;;  %v535_v19 = vrot.slane %v534_v13, 2  ;;  %v283_v20 = vmax.f32 %v114_v9, %v282_v14  ;;  %v115_v22 = vsel %vm86_vm0, %v45_v11, -inf }
  0xb9   :  { %v113_v23 = vmax.f32 %v111_v7, %v112_v60  ;;  %v1014_v24 = vmax.f32 %v445_v41, %v281_v15  ;;  %v541_v25 = vmax.f32 %v539_v10, %v540_v16  ;;  %v116_v26 = vmax.f32 %v114_v9, %v115_v22 }
  0xba   :  { %v529_v21 = vmax.f32 %v527_v3, %v528_v18  ;;  %v536_v27 = vmax.f32 %v534_v13, %v535_v19  ;;  %v284_v28 = vrot.slane %v283_v20, 2  ;;  %v288_v29 = vrot.slane %v115_v22, 4 }
  0xbb   :  { %v1016_v30 = vmax.f32 %v231_v49, %v113_v23  ;;  %v542_v31 = vrot.slane %v541_v25, 2  ;;  %v117_v32 = vrot.slane %v116_v26, 4  ;;  %v547_v33 = vsel %vm476_vm3, %v45_v11, -inf }
  0xbc   :  { %v530_v34 = vrot.slane %v529_v21, 1  ;;  %v537_v35 = vrot.slane %v536_v27, 1  ;;  %v285_v36 = vmax.f32 %v283_v20, %v284_v28  ;;  %v289_v37 = vmax.f32 %v115_v22, %v288_v29 }
  0xbd   :  { %v543_v38 = vmax.f32 %v541_v25, %v542_v31  ;;  %v118_v40 = vmax.f32 %v116_v26, %v117_v32  ;;  %v548_v41 = vmax.f32 %v546_v17, %v547_v33  ;;  %v555_v42 = vsel %vm485_vm4, %v45_v11, -inf }
  0xbe   :  { %v531_v43 = vmax.f32 %v529_v21, %v530_v34  ;;  %v538_v44 = vmax.f32 %v536_v27, %v537_v35  ;;  %v286_v45 = vrot.slane %v285_v36, 1  ;;  %v290_v46 = vrot.slane %v289_v37, 2 }
  0xbf   :  { %v544_v47 = vrot.slane %v543_v38, 1  ;;  %v119_v48 = vrot.slane %v118_v40, 2  ;;  %v549_v49 = vrot.slane %v548_v41, 4  ;;  %v556_v50 = vrot.slane %v555_v42, 4 }
  0xc0   :  { %v1020_v51 = vmax.f32 %v843_v62, %v531_v43  ;;  %v1022_v52 = vmax.f32 %v848_v63, %v538_v44  ;;  %v1024_v53 = vmax.f32 %v285_v36, %v286_v45  ;;  %v291_v54 = vmax.f32 %v289_v37, %v290_v46  ;;  %v47_v62 = vpop.trf.xlu0 }
  0xc1   :  { %v1026_v56 = vmax.f32 %v543_v38, %v544_v47  ;;  %v120_v57 = vmax.f32 %v118_v40, %v119_v48  ;;  %v550_v55 = vmax.f32 %v548_v41, %v549_v49  ;;  %v557_v58 = vmax.f32 %v555_v42, %v556_v50 }
  0xc2   :  { %v440_v59 = vmax.f32 %v1006_v2, %v1024_v53  ;;  %v292_v61 = vrot.slane %v291_v54, 1  ;;  %v123_v0 = vsel %vm86_vm0, %v46_v39, -inf  ;;  %v562_v1 = vsel %vm466_vm1, %v46_v39, -inf }
  0xc3   :  { %v840_v63 = vmax.f32 %v1010_v12, %v1026_v56  ;;  %v121_v4 = vrot.slane %v120_v57, 1  ;;  %v551_v5 = vrot.slane %v550_v55, 2  ;;  %v558_v6 = vrot.slane %v557_v58, 2 }
  0xc4   :  { %v293_v7 = vmax.f32 %v291_v54, %v292_v61  ;;  %v294_v8 = vrot.slane %v123_v0, 4  ;;  %v563_v9 = vrot.slane %v562_v1, 4  ;;  %v569_v10 = vsel %vm474_vm2, %v46_v39, -inf  ;;  %v48_v29 = vpop.trf.xlu0 }
  0xc5   :  { %v122_v11 = vmax.f32 %v120_v57, %v121_v4  ;;  %v552_v3 = vmax.f32 %v550_v55, %v551_v5  ;;  %v559_v2 = vmax.f32 %v557_v58, %v558_v6  ;;  %v124_v13 = vsel %vm86_vm0, %v47_v62, -inf }
  0xc6   :  { %v447_v14 = vmax.f32 %v1014_v24, %v293_v7  ;;  %v295_v60 = vmax.f32 %v123_v0, %v294_v8  ;;  %v564_v15 = vmax.f32 %v562_v1, %v563_v9  ;;  %v125_v16 = vmax.f32 %v123_v0, %v124_v13 }
  0xc7   :  { %v233_v12 = vmax.f32 %v1016_v30, %v122_v11  ;;  %v553_v17 = vrot.slane %v552_v3, 1  ;;  %v560_v18 = vrot.slane %v559_v2, 1  ;;  %v300_v19 = vrot.slane %v124_v13, 4 }
  0xc8   :  { %v296_v20 = vrot.slane %v295_v60, 2  ;;  %v565_v22 = vrot.slane %v564_v15, 2  ;;  %v126_v23 = vrot.slane %v125_v16, 4  ;;  %v570_v25 = vsel %vm476_vm3, %v47_v62, -inf  ;;  %v49_v53 = vpop.trf.xlu0 }
  0xc9   :  { %v554_v26 = vmax.f32 %v552_v3, %v553_v17  ;;  %v561_v21 = vmax.f32 %v559_v2, %v560_v18  ;;  %v301_v27 = vmax.f32 %v124_v13, %v300_v19  ;;  %v571_v28 = vmax.f32 %v569_v10, %v570_v25 }
  0xca   :  { %v297_v31 = vmax.f32 %v295_v60, %v296_v20  ;;  %v566_v24 = vmax.f32 %v564_v15, %v565_v22  ;;  %v127_v32 = vmax.f32 %v125_v16, %v126_v23  ;;  %v578_v33 = vsel %vm485_vm4, %v47_v62, -inf }
  0xcb   :  { %v845_v30 = vmax.f32 %v1020_v51, %v554_v26  ;;  %v850_v34 = vmax.f32 %v1022_v52, %v561_v21  ;;  %v302_v35 = vrot.slane %v301_v27, 2  ;;  %v572_v36 = vrot.slane %v571_v28, 4 }
  0xcc   :  { %v298_v37 = vrot.slane %v297_v31, 1  ;;  %v567_v39 = vrot.slane %v566_v24, 1  ;;  %v128_v38 = vrot.slane %v127_v32, 2  ;;  %v579_v40 = vrot.slane %v578_v33, 4  ;;  %v50_v13 = vpop.trf.xlu0 }
  0xcd   :  { %v303_v41 = vmax.f32 %v301_v27, %v302_v35  ;;  %v573_v42 = vmax.f32 %v571_v28, %v572_v36  ;;  %v132_v43 = vsel %vm86_vm0, %v48_v29, -inf  ;;  %v585_v44 = vsel %vm466_vm1, %v48_v29, -inf }
  0xce   :  { %v299_v45 = vmax.f32 %v297_v31, %v298_v37  ;;  %v568_v46 = vmax.f32 %v566_v24, %v567_v39  ;;  %v129_v47 = vmax.f32 %v127_v32, %v128_v38  ;;  %v580_v48 = vmax.f32 %v578_v33, %v579_v40 }
  0xcf   :  { %v304_v49 = vrot.slane %v303_v41, 1  ;;  %v574_v50 = vrot.slane %v573_v42, 2  ;;  %v306_v51 = vrot.slane %v132_v43, 4  ;;  %v586_v52 = vrot.slane %v585_v44, 4 }
  0xd0   :  { %v1044_v54 = vmax.f32 %v440_v59, %v299_v45  ;;  %v1046_v56 = vmax.f32 %v840_v63, %v568_v46  ;;  %v130_v57 = vrot.slane %v129_v47, 1  ;;  %v581_v55 = vrot.slane %v580_v48, 2  ;;  %v51_v28 = vpop.trf.xlu0 }
  0xd1   :  { %v305_v58 = vmax.f32 %v303_v41, %v304_v49  ;;  %v575_v61 = vmax.f32 %v573_v42, %v574_v50  ;;  %v307_v0 = vmax.f32 %v132_v43, %v306_v51  ;;  %v587_v7 = vmax.f32 %v585_v44, %v586_v52 }
  0xd2   :  { %v131_v1 = vmax.f32 %v129_v47, %v130_v57  ;;  %v582_v62 = vmax.f32 %v580_v48, %v581_v55  ;;  %v133_v59 = vsel %vm86_vm0, %v49_v53, -inf  ;;  %v593_v63 = vsel %vm476_vm3, %v49_v53, -inf }
  0xd3   :  { %v1048_v4 = vmax.f32 %v447_v14, %v305_v58  ;;  %v576_v5 = vrot.slane %v575_v61, 1  ;;  %v308_v6 = vrot.slane %v307_v0, 2  ;;  %v592_v3 = vsel %vm474_vm2, %v48_v29, -inf }
  0xd4   :  { %v1050_v8 = vmax.f32 %v233_v12, %v131_v1  ;;  %v583_v9 = vrot.slane %v582_v62, 1  ;;  %v134_v2 = vmax.f32 %v132_v43, %v133_v59  ;;  %v594_v15 = vmax.f32 %v592_v3, %v593_v63  ;;  %v52_v42 = vpop.trf.xlu0 }
  0xd5   :  { %v577_v10 = vmax.f32 %v575_v61, %v576_v5  ;;  %v309_v11 = vmax.f32 %v307_v0, %v308_v6  ;;  %v588_v12 = vrot.slane %v587_v7, 2  ;;  %v601_v19 = vsel %vm485_vm4, %v49_v53, -inf }
  0xd6   :  { %v584_v60 = vmax.f32 %v582_v62, %v583_v9  ;;  %v135_v17 = vrot.slane %v134_v2, 4  ;;  %v595_v23 = vrot.slane %v594_v15, 4  ;;  %v602_v21 = vrot.slane %v601_v19, 4 }
  0xd7   :  { %v1055_v14 = vmax.f32 %v845_v30, %v577_v10  ;;  %v310_v16 = vrot.slane %v309_v11, 1  ;;  %v608_v27 = vsel %vm466_vm1, %v50_v13, -inf  ;;  %v589_v29 = vmax.f32 %v587_v7, %v588_v12 }
  0xd8   :  { %v1057_v18 = vmax.f32 %v850_v34, %v584_v60  ;;  %v136_v22 = vmax.f32 %v134_v2, %v135_v17  ;;  %v312_v24 = vrot.slane %v133_v59, 4  ;;  %v609_v32 = vrot.slane %v608_v27, 4  ;;  %v53_v9 = vpop.trf.xlu0 }
  0xd9   :  { %v1060_v20 = vmax.f32 %v309_v11, %v310_v16  ;;  %v596_v33 = vmax.f32 %v594_v15, %v595_v23  ;;  %v603_v34 = vmax.f32 %v601_v19, %v602_v21  ;;  %v590_v36 = vrot.slane %v589_v29, 1 }
  0xda   :  { %v137_v26 = vrot.slane %v136_v22, 2  ;;  %v610_v35 = vmax.f32 %v608_v27, %v609_v32  ;;  %v141_v37 = vsel %vm86_vm0, %v50_v13, -inf  ;;  %v313_v38 = vmax.f32 %v133_v59, %v312_v24 }
  0xdb   :  { %v442_v25 = vmax.f32 %v1044_v54, %v1060_v20  ;;  %v142_v41 = vsel %vm86_vm0, %v51_v28, -inf  ;;  %v597_v43 = vrot.slane %v596_v33, 2  ;;  %v604_v45 = vrot.slane %v603_v34, 2 }
  0xdc   :  { %v138_v31 = vmax.f32 %v136_v22, %v137_v26  ;;  %v611_v40 = vrot.slane %v610_v35, 2  ;;  %v318_v46 = vrot.slane %v141_v37, 4  ;;  %v615_v48 = vsel %vm474_vm2, %v50_v13, -inf  ;;  %v70_v32 = vpop.trf.xlu0 }
  0xdd   :  { %v143_v49 = vmax.f32 %v141_v37, %v142_v41  ;;  %v616_v50 = vsel %vm476_vm3, %v51_v28, -inf  ;;  %v624_v51 = vsel %vm485_vm4, %v51_v28, -inf  ;;  %v1074_v52 = vmax.f32 %v589_v29, %v590_v36 }
  0xde   :  { %v139_v30 = vrot.slane %v138_v31, 1  ;;  %v612_v47 = vmax.f32 %v610_v35, %v611_v40  ;;  %v314_v53 = vrot.slane %v313_v38, 2  ;;  %v617_v55 = vmax.f32 %v615_v48, %v616_v50 }
  0xdf   :  { %v598_v58 = vmax.f32 %v596_v33, %v597_v43  ;;  %v625_v61 = vrot.slane %v624_v51, 4  ;;  %v150_v0 = vsel %vm86_vm0, %v52_v42, -inf  ;;  %v631_v1 = vsel %vm466_vm1, %v52_v42, -inf }
  0xe0   :  { %v1066_v39 = vmax.f32 %v138_v31, %v139_v30  ;;  %v613_v57 = vrot.slane %v612_v47, 1  ;;  %v605_v62 = vmax.f32 %v603_v34, %v604_v45  ;;  %v319_v5 = vmax.f32 %v141_v37, %v318_v46 }
  0xe1   :  { %v618_v7 = vrot.slane %v617_v55, 4  ;;  %v144_v59 = vrot.slane %v143_v49, 4  ;;  %v324_v63 = vrot.slane %v142_v41, 4  ;;  %v626_v10 = vmax.f32 %v624_v51, %v625_v61 }
  0xe2   :  { %v235_v44 = vmax.f32 %v1050_v8, %v1066_v39  ;;  %v1078_v6 = vmax.f32 %v612_v47, %v613_v57  ;;  %v330_v2 = vrot.slane %v150_v0, 4  ;;  %v632_v13 = vrot.slane %v631_v1, 4 }
  0xe3   :  { %v619_v3 = vmax.f32 %v617_v55, %v618_v7  ;;  %v315_v60 = vmax.f32 %v313_v38, %v314_v53  ;;  %v599_v15 = vrot.slane %v598_v58, 1  ;;  %v627_v16 = vrot.slane %v626_v10, 2 }
  0xe4   :  { %v853_v11 = vmax.f32 %v1074_v52, %v1078_v6  ;;  %v606_v17 = vrot.slane %v605_v62, 1  ;;  %v320_v12 = vrot.slane %v319_v5, 2  ;;  %v151_v22 = vsel %vm86_vm0, %v53_v9, -inf }
  0xe5   :  { %v620_v19 = vrot.slane %v619_v3, 2  ;;  %v145_v23 = vmax.f32 %v143_v49, %v144_v59  ;;  %v325_v26 = vmax.f32 %v142_v41, %v324_v63  ;;  %v628_v21 = vmax.f32 %v626_v10, %v627_v16 }
  0xe6   :  { %v152_v27 = vmax.f32 %v150_v0, %v151_v22  ;;  %v331_v29 = vmax.f32 %v150_v0, %v330_v2  ;;  %v633_v31 = vmax.f32 %v631_v1, %v632_v13  ;;  %v639_v24 = vsel %vm476_vm3, %v53_v9, -inf }
  0xe7   :  { %v621_v28 = vmax.f32 %v619_v3, %v620_v19  ;;  %v316_v33 = vrot.slane %v315_v60, 1  ;;  %v629_v30 = vrot.slane %v628_v21, 1  ;;  %v336_v35 = vrot.slane %v151_v22, 4 }
  0xe8   :  { %v153_v34 = vrot.slane %v152_v27, 4  ;;  %v1084_v36 = vmax.f32 %v598_v58, %v599_v15  ;;  %v1086_v37 = vmax.f32 %v605_v62, %v606_v17  ;;  %v638_v40 = vsel %vm474_vm2, %v52_v42, -inf  ;;  %v71_v58 = vpop.trf.xlu0 }
  0xe9   :  { %v622_v38 = vrot.slane %v621_v28, 1  ;;  %v321_v41 = vmax.f32 %v319_v5, %v320_v12  ;;  %v326_v43 = vrot.slane %v325_v26, 2  ;;  %v1089_v45 = vmax.f32 %v628_v21, %v629_v30 }
  0xea   :  { %v640_v46 = vmax.f32 %v638_v40, %v639_v24  ;;  %v146_v47 = vrot.slane %v145_v23, 2  ;;  %v332_v49 = vrot.slane %v331_v29, 2  ;;  %v634_v50 = vrot.slane %v633_v31, 2 }
  0xeb   :  { %v1091_v48 = vmax.f32 %v621_v28, %v622_v38  ;;  %v864_v51 = vmax.f32 %v1086_v37, %v1089_v45  ;;  %v154_v53 = vmax.f32 %v152_v27, %v153_v34  ;;  %v337_v57 = vmax.f32 %v151_v22, %v336_v35 }
  0xec   :  { %v647_v42 = vsel %vm485_vm4, %v53_v9, -inf  ;;  %v317_v61 = vmax.f32 %v315_v60, %v316_v33  ;;  %v322_v0 = vrot.slane %v321_v41, 1  ;;  %v641_v1 = vrot.slane %v640_v46, 4  ;;  %v72_v34 = vpop.trf.xlu0 }
  0xed   :  { %v859_v55 = vmax.f32 %v1084_v36, %v1091_v48  ;;  %v654_v62 = vsel %vm466_vm1, %v70_v32, -inf  ;;  %v147_v5 = vmax.f32 %v145_v23, %v146_v47  ;;  %v327_v7 = vmax.f32 %v325_v26, %v326_v43 }
  0xee   :  { %v333_v59 = vmax.f32 %v331_v29, %v332_v49  ;;  %v635_v63 = vmax.f32 %v633_v31, %v634_v50  ;;  %v155_v10 = vrot.slane %v154_v53, 2  ;;  %v338_v3 = vrot.slane %v337_v57, 2 }
  0xef   :  { %v648_v2 = vrot.slane %v647_v42, 4  ;;  %v160_v13 = vsel %vm86_vm0, %v71_v58, -inf  ;;  %v159_v15 = vsel %vm86_vm0, %v70_v32, -inf  ;;  %v655_v16 = vrot.slane %v654_v62, 4 }
  0xf0   :  { %v842_v9 = vmax.f32 %v1046_v56, 0.0  ;;  %v449_v60 = vmax.f32 %v1048_v4, %v317_v61  ;;  %v642_v17 = vmax.f32 %v640_v46, %v641_v1  ;;  %v161_v12 = vmax.f32 %v159_v15, %v160_v13 }
  0xf1   :  { %v323_v19 = vmax.f32 %v321_v41, %v322_v0  ;;  %v148_v22 = vrot.slane %v147_v5, 1  ;;  %v328_v23 = vrot.slane %v327_v7, 1  ;;  %v334_v26 = vrot.slane %v333_v59, 1 }
  0xf2   :  { %v636_v21 = vrot.slane %v635_v63, 1  ;;  %v156_v27 = vmax.f32 %v154_v53, %v155_v10  ;;  %v339_v28 = vmax.f32 %v337_v57, %v338_v3  ;;  %v649_v29 = vmax.f32 %v647_v42, %v648_v2 }
  0xf3   :  { %v342_v31 = vrot.slane %v159_v15, 4  ;;  %v656_v24 = vmax.f32 %v654_v62, %v655_v16  ;;  %v661_v33 = vsel %vm474_vm2, %v70_v32, -inf  ;;  %v662_v30 = vsel %vm476_vm3, %v71_v58, -inf }
  0xf4   :  { %v643_v35 = vrot.slane %v642_v17, 2  ;;  %v162_v38 = vrot.slane %v161_v12, 4  ;;  %v348_v4 = vrot.slane %v160_v13, 4  ;;  %v663_v40 = vmax.f32 %v661_v33, %v662_v30 }
  0xf5   :  { %v1108_v41 = vmax.f32 %v442_v25, %v323_v19  ;;  %v149_v43 = vmax.f32 %v147_v5, %v148_v22  ;;  %v329_v46 = vmax.f32 %v327_v7, %v328_v23  ;;  %v1110_v47 = vmax.f32 %v333_v59, %v334_v26  ;;  %v73_v59 = vpop.trf.xlu0 }
  0xf6   :  { %v340_v49 = vrot.slane %v339_v28, 1  ;;  %v650_v50 = vrot.slane %v649_v29, 2  ;;  %v664_v53 = vrot.slane %v663_v40, 4  ;;  %v670_v32 = vsel %vm485_vm4, %v71_v58, -inf }
  0xf7   :  { %v637_v57 = vmax.f32 %v635_v63, %v636_v21  ;;  %v343_v42 = vmax.f32 %v159_v15, %v342_v31  ;;  %v657_v61 = vrot.slane %v656_v24, 2  ;;  %v677_v0 = vsel %vm466_vm1, %v72_v34, -inf }
  0xf8   :  { %v157_v1 = vrot.slane %v156_v27, 1  ;;  %v644_v62 = vmax.f32 %v642_v17, %v643_v35  ;;  %v163_v10 = vmax.f32 %v161_v12, %v162_v38  ;;  %v349_v54 = vmax.f32 %v160_v13, %v348_v4 }
  0xf9   :  { %v1117_v20 = vmax.f32 %v235_v44, %v149_v43  ;;  %v1119_v25 = vmax.f32 %v449_v60, %v329_v46  ;;  %v665_v5 = vmax.f32 %v663_v40, %v664_v53  ;;  %v671_v7 = vrot.slane %v670_v32, 4  ;;  %v74_v31 = vpop.trf.xlu0 }
  0xfa   :  { %v1121_v58 = vmax.f32 %v339_v28, %v340_v49  ;;  %v651_v63 = vmax.f32 %v649_v29, %v650_v50  ;;  %v168_v3 = vsel %vm86_vm0, %v72_v34, -inf  ;;  %v678_v2 = vrot.slane %v677_v0, 4 }
  0xfb   :  { %v444_v15 = vmax.f32 %v1108_v41, %v1110_v47  ;;  %v1129_v8 = vmax.f32 %v853_v11, %v637_v57  ;;  %v344_v39 = vrot.slane %v343_v42, 2  ;;  %v658_v44 = vmax.f32 %v656_v24, %v657_v61 }
  0xfc   :  { %v1131_v13 = vmax.f32 %v156_v27, %v157_v1  ;;  %v645_v16 = vrot.slane %v644_v62, 1  ;;  %v164_v60 = vrot.slane %v163_v10, 2  ;;  %v350_v17 = vrot.slane %v349_v54, 2 }
  0xfd   :  { %v666_v12 = vrot.slane %v665_v5, 2  ;;  %v672_v19 = vmax.f32 %v670_v32, %v671_v7  ;;  %v354_v22 = vrot.slane %v168_v3, 4  ;;  %v685_v23 = vsel %vm476_vm3, %v73_v59, -inf }
  0xfe   :  { %v451_v26 = vmax.f32 %v1119_v25, %v1121_v58  ;;  %v652_v21 = vrot.slane %v651_v63, 1  ;;  %v679_v28 = vmax.f32 %v677_v0, %v678_v2  ;;  %v684_v52 = vsel %vm474_vm2, %v72_v34, -inf }
  0xff   :  { %v345_v6 = vmax.f32 %v343_v42, %v344_v39  ;;  %v659_v11 = vrot.slane %v658_v44, 1  ;;  %v169_v27 = vsel %vm86_vm0, %v73_v59, -inf  ;;  %v686_v29 = vmax.f32 %v684_v52, %v685_v23 }
 0x100   :  { %v646_v24 = vmax.f32 %v644_v62, %v645_v16  ;;  %v165_v33 = vmax.f32 %v163_v10, %v164_v60  ;;  %v351_v30 = vmax.f32 %v349_v54, %v350_v17  ;;  %v693_v35 = vsel %vm485_vm4, %v73_v59, -inf  ;;  %v75_v59 = vpop.trf.xlu0 }
 0x101   :  { %v667_v38 = vmax.f32 %v665_v5, %v666_v12  ;;  %v673_v4 = vrot.slane %v672_v19, 2  ;;  %v355_v40 = vmax.f32 %v168_v3, %v354_v22  ;;  %v687_v43 = vrot.slane %v686_v29, 4 }
 0x102   :  { %v653_v46 = vmax.f32 %v651_v63, %v652_v21  ;;  %v680_v49 = vrot.slane %v679_v28, 2  ;;  %v170_v50 = vmax.f32 %v168_v3, %v169_v27  ;;  %v694_v53 = vrot.slane %v693_v35, 4 }
 0x103   :  { %v237_v34 = vmax.f32 %v1117_v20, %v1131_v13  ;;  %v346_v32 = vrot.slane %v345_v6, 1  ;;  %v1141_v57 = vmax.f32 %v658_v44, %v659_v11  ;;  %v688_v42 = vmax.f32 %v686_v29, %v687_v43 }
 0x104   :  { %v166_v61 = vrot.slane %v165_v33, 1  ;;  %v352_v0 = vrot.slane %v351_v30, 1  ;;  %v360_v1 = vrot.slane %v169_v27, 4  ;;  %v695_v62 = vmax.f32 %v693_v35, %v694_v53  ;;  %v1166_v29 = vpop.trf.xlu0 }
 0x105   :  { %v1146_v10 = vmax.f32 %v859_v55, %v646_v24  ;;  %v668_v54 = vrot.slane %v667_v38, 1  ;;  %v674_v5 = vmax.f32 %v672_v19, %v673_v4  ;;  %v356_v7 = vrot.slane %v355_v40, 2 }
 0x106   :  { %v1151_v63 = vmax.f32 %v864_v51, %v653_v46  ;;  %v681_v3 = vmax.f32 %v679_v28, %v680_v49  ;;  %v171_v2 = vrot.slane %v170_v50, 4  ;;  %v700_v39 = vsel %vm466_vm1, %v74_v31, -inf }
 0x107   :  { %v1154_v44 = vmax.f32 %v345_v6, %v346_v32  ;;  %v855_v36 = vmax.f32 %v1129_v8, %v1141_v57  ;;  %v689_v48 = vrot.slane %v688_v42, 2  ;;  %v701_v55 = vrot.slane %v700_v39, 4 }
 0x108   :  { %v1158_v16 = vmax.f32 %v165_v33, %v166_v61  ;;  %v1160_v60 = vmax.f32 %v351_v30, %v352_v0  ;;  %v361_v17 = vmax.f32 %v169_v27, %v360_v1  ;;  %v696_v12 = vrot.slane %v695_v62, 2 }
 0x109   :  { %v669_v37 = vmax.f32 %v667_v38, %v668_v54  ;;  %v675_v45 = vrot.slane %v674_v5, 1  ;;  %v357_v51 = vmax.f32 %v355_v40, %v356_v7  ;;  %v702_v19 = vmax.f32 %v700_v39, %v701_v55 }
 0x10a   :  { %v682_v22 = vrot.slane %v681_v3, 1  ;;  %v172_v23 = vmax.f32 %v170_v50, %v171_v2  ;;  %v178_v21 = vsel %vm86_vm0, %v75_v59, -inf  ;;  %v708_v28 = vsel %vm476_vm3, %v75_v59, -inf }
 0x10b   :  { %v690_v52 = vmax.f32 %v688_v42, %v689_v48  ;;  %v177_v8 = vsel %vm86_vm0, %v74_v31, -inf  ;;  %v703_v6 = vrot.slane %v702_v19, 2  ;;  %v707_v11 = vsel %vm474_vm2, %v74_v31, -inf }
 0x10c   :  { %v362_v27 = vrot.slane %v361_v17, 2  ;;  %v697_v24 = vmax.f32 %v695_v62, %v696_v12  ;;  %v709_v33 = vmax.f32 %v707_v11, %v708_v28  ;;  %v716_v30 = vsel %vm485_vm4, %v75_v59, -inf  ;;  %v77_v59 = vpop.trf.xlu0 }
 0x10d   :  { %v676_v35 = vmax.f32 %v674_v5, %v675_v45  ;;  %v358_v38 = vrot.slane %v357_v51, 1  ;;  %v704_v4 = vmax.f32 %v702_v19, %v703_v6  ;;  %v179_v40 = vmax.f32 %v177_v8, %v178_v21 }
 0x10e   :  { %v861_v43 = vmax.f32 %v1146_v10, %v669_v37  ;;  %v366_v46 = vrot.slane %v177_v8, 4  ;;  %v710_v49 = vrot.slane %v709_v33, 4  ;;  %v717_v50 = vrot.slane %v716_v30, 4 }
 0x10f   :  { %v683_v53 = vmax.f32 %v681_v3, %v682_v22  ;;  %v691_v32 = vrot.slane %v690_v52, 1  ;;  %v705_v57 = vrot.slane %v704_v4, 1  ;;  %v372_v31 = vrot.slane %v178_v21, 4 }
 0x110   :  { %v698_v42 = vrot.slane %v697_v24, 1  ;;  %v711_v61 = vmax.f32 %v709_v33, %v710_v49  ;;  %v718_v0 = vmax.f32 %v716_v30, %v717_v50  ;;  %v186_v1 = vsel %vm86_vm0, %v1166_v29, -inf }
 0x111   :  { %v866_v62 = vmax.f32 %v1151_v63, %v676_v35  ;;  %v173_v54 = vrot.slane %v172_v23, 2  ;;  %v363_v5 = vmax.f32 %v361_v17, %v362_v27  ;;  %v180_v7 = vrot.slane %v179_v40, 4 }
 0x112   :  { %v367_v10 = vmax.f32 %v177_v8, %v366_v46  ;;  %v706_v2 = vmax.f32 %v704_v4, %v705_v57  ;;  %v712_v39 = vrot.slane %v711_v61, 2  ;;  %v719_v48 = vrot.slane %v718_v0, 2 }
 0x113   :  { %v856_v3 = vmax.f32 %v855_v36, %v683_v53  ;;  %v692_v55 = vmax.f32 %v690_v52, %v691_v32  ;;  %v373_v12 = vmax.f32 %v178_v21, %v372_v31  ;;  %v378_v37 = vrot.slane %v186_v1, 4 }
 0x114   :  { %v699_v45 = vmax.f32 %v697_v24, %v698_v42  ;;  %v713_v19 = vmax.f32 %v711_v61, %v712_v39  ;;  %v720_v22 = vmax.f32 %v718_v0, %v719_v48  ;;  %v723_v28 = vsel %vm466_vm1, %v1166_v29, -inf  ;;  %v78_v24 = vpop.trf.xlu0 }
 0x115   :  { %v1175_v6 = vmax.f32 %v357_v51, %v358_v38  ;;  %v174_v63 = vmax.f32 %v172_v23, %v173_v54  ;;  %v181_v17 = vmax.f32 %v179_v40, %v180_v7  ;;  %v187_v11 = vsel %vm86_vm0, %v77_v59, -inf }
 0x116   :  { %v368_v8 = vrot.slane %v367_v10, 2  ;;  %v857_v27 = vmax.f32 %v856_v3, %v706_v2  ;;  %v714_v33 = vrot.slane %v713_v19, 1  ;;  %v721_v30 = vrot.slane %v720_v22, 1 }
 0x117   :  { %v862_v36 = vmax.f32 %v861_v43, %v692_v55  ;;  %v374_v52 = vrot.slane %v373_v12, 2  ;;  %v379_v21 = vmax.f32 %v186_v1, %v378_v37  ;;  %v724_v35 = vrot.slane %v723_v28, 4 }
 0x118   :  { %v867_v4 = vmax.f32 %v866_v62, %v699_v45  ;;  %v715_v46 = vmax.f32 %v713_v19, %v714_v33  ;;  %v722_v49 = vmax.f32 %v720_v22, %v721_v30  ;;  %v188_v50 = vmax.f32 %v186_v1, %v187_v11  ;;  %v79_v48 = vpop.trf.xlu0 }
 0x119   :  { %v364_v53 = vrot.slane %v363_v5, 1  ;;  %v182_v51 = vrot.slane %v181_v17, 2  ;;  %v384_v23 = vrot.slane %v187_v11, 4  ;;  %v858_v38 = vmax.f32 %v857_v27, 0.0 }
 0x11a   :  { %v863_v40 = vmax.f32 %v862_v36, %v715_v46  ;;  %v868_v32 = vmax.f32 %v867_v4, %v722_v49  ;;  %v369_v57 = vmax.f32 %v367_v10, %v368_v8  ;;  %v375_v31 = vmax.f32 %v373_v12, %v374_v52 }
 0x11b   :  { %v380_v42 = vrot.slane %v379_v21, 2  ;;  %v725_v43 = vmax.f32 %v723_v28, %v724_v35  ;;  %v189_v54 = vrot.slane %v188_v50, 4  ;;  %v731_v62 = vsel %vm476_vm3, %v77_v59, -inf }
 0x11c   :  { %v869_v61 = vmax.f32 %v868_v32, 0.0  ;;  %v899_v0 = vsel %vm885_vm5, %v858_v38, %v863_v40  ;;  %v175_v7 = vrot.slane %v174_v63, 1  ;;  %v365_v1 = vmax.f32 %v363_v5, %v364_v53 }
 0x11d   :  { %v183_v2 = vmax.f32 %v181_v17, %v182_v51  ;;  %v385_v39 = vmax.f32 %v187_v11, %v384_v23  ;;  %v730_v10 = vsel %vm474_vm2, %v1166_v29, -inf  ;;  %v195_v55 = vsel %vm86_vm0, %v78_v24, -inf  ;;  %v80_v23 = vpop.trf.xlu0 }
 0x11e   :  { %v1181_v3 = vsel %vm887_vm6, %v899_v0, %v869_v61  ;;  %v746_v12 = vsel %vm466_vm1, %v78_v24, -inf  ;;  %v370_v37 = vrot.slane %v369_v57, 1  ;;  %v376_v45 = vrot.slane %v375_v31, 1 }
 0x11f   :  { %v381_v19 = vmax.f32 %v379_v21, %v380_v42  ;;  %v732_v22 = vmax.f32 %v730_v10, %v731_v62  ;;  %v726_v28 = vrot.slane %v725_v43, 2  ;;  %v190_v8 = vmax.f32 %v188_v50, %v189_v54 }
 0x120   :  { %v739_v5 = vsel %vm485_vm4, %v77_v59, -inf  ;;  %v196_v17 = vsel %vm86_vm0, %v79_v48, -inf  ;;  %v238_v11 = vmax.f32 %v237_v34, %v1158_v16  ;;  %v386_v29 = vrot.slane %v385_v39, 2 }
 0x121   :  { %v390_v27 = vrot.slane %v195_v55, 4  ;;  %v747_v33 = vrot.slane %v746_v12, 4  ;;  %v452_v30 = vmax.f32 %v1154_v44, %v1175_v6  ;;  %v176_v36 = vmax.f32 %v174_v63, %v175_v7 }
 0x122   :  { %v184_v52 = vrot.slane %v183_v2, 1  ;;  %v197_v21 = vmax.f32 %v195_v55, %v196_v17  ;;  %v459_v35 = vmax.f32 %v1160_v60, %v365_v1  ;;  %v371_v4 = vmax.f32 %v369_v57, %v370_v37 }
 0x123   :  { %v733_v59 = vrot.slane %v732_v22, 4  ;;  %v740_v46 = vrot.slane %v739_v5, 4  ;;  %v377_v49 = vmax.f32 %v375_v31, %v376_v45  ;;  %v382_v50 = vrot.slane %v381_v19, 1  ;;  %v81_v45 = vpop.trf.xlu0 }
 0x124   :  { %v727_v53 = vmax.f32 %v725_v43, %v726_v28  ;;  %v191_v51 = vrot.slane %v190_v8, 2  ;;  %v387_v20 = vmax.f32 %v385_v39, %v386_v29  ;;  %v391_v13 = vmax.f32 %v195_v55, %v390_v27 }
 0x125   :  { %v748_v34 = vmax.f32 %v746_v12, %v747_v33  ;;  %v754_v16 = vsel %vm476_vm3, %v79_v48, -inf  ;;  %v185_v38 = vmax.f32 %v183_v2, %v184_v52  ;;  %v753_v44 = vsel %vm474_vm2, %v78_v24, -inf }
 0x126   :  { %v198_v6 = vrot.slane %v197_v21, 4  ;;  %v396_v63 = vrot.slane %v196_v17, 4  ;;  %v239_v40 = vmax.f32 %v238_v11, %v176_v36  ;;  %v734_v60 = vmax.f32 %v732_v22, %v733_v59 }
 0x127   :  { %v741_v32 = vmax.f32 %v739_v5, %v740_v46  ;;  %v755_v57 = vmax.f32 %v753_v44, %v754_v16  ;;  %v1198_v42 = vmax.f32 %v452_v30, %v371_v4  ;;  %v1200_v31 = vmax.f32 %v381_v19, %v382_v50  ;;  %v82_v44 = vpop.trf.xlu0 }
 0x128   :  { %v728_v43 = vrot.slane %v727_v53, 1  ;;  %v192_v61 = vmax.f32 %v190_v8, %v191_v51  ;;  %v388_v0 = vrot.slane %v387_v20, 1  ;;  %v392_v54 = vrot.slane %v391_v13, 2 }
 0x129   :  { %v749_v62 = vrot.slane %v748_v34, 2  ;;  %v762_v7 = vsel %vm485_vm4, %v79_v48, -inf  ;;  %v1203_v1 = vmax.f32 %v239_v40, %v185_v38  ;;  %v1205_v24 = vmax.f32 %v459_v35, %v377_v49 }
 0x12a   :  { %v199_v2 = vmax.f32 %v197_v21, %v198_v6  ;;  %v397_v39 = vmax.f32 %v196_v17, %v396_v63  ;;  %v735_v10 = vrot.slane %v734_v60, 2  ;;  %v742_v55 = vrot.slane %v741_v32, 2 }
 0x12b   :  { %v756_v12 = vrot.slane %v755_v57, 4  ;;  %v204_v37 = vsel %vm86_vm0, %v80_v23, -inf  ;;  %v454_v19 = vmax.f32 %v1198_v42, %v1200_v31  ;;  %v1210_v22 = vmax.f32 %v727_v53, %v728_v43 }
 0x12c   :  { %v193_v28 = vrot.slane %v192_v61, 1  ;;  %v763_v8 = vrot.slane %v762_v7, 4  ;;  %v1212_v48 = vmax.f32 %v387_v20, %v388_v0  ;;  %v393_v5 = vmax.f32 %v391_v13, %v392_v54 }
 0x12d   :  { %v750_v11 = vmax.f32 %v748_v34, %v749_v62  ;;  %v769_v29 = vsel %vm466_vm1, %v80_v23, -inf  ;;  %v200_v17 = vrot.slane %v199_v2, 2  ;;  %v398_v27 = vrot.slane %v397_v39, 2 }
 0x12e   :  { %v402_v33 = vrot.slane %v204_v37, 4  ;;  %v205_v30 = vsel %vm86_vm0, %v81_v45, -inf  ;;  %v736_v36 = vmax.f32 %v734_v60, %v735_v10  ;;  %v743_v52 = vmax.f32 %v741_v32, %v742_v55 }
 0x12f   :  { %v757_v21 = vmax.f32 %v755_v57, %v756_v12  ;;  %v206_v35 = vmax.f32 %v204_v37, %v205_v30  ;;  %v1216_v4 = vmax.f32 %v192_v61, %v193_v28  ;;  %v764_v59 = vmax.f32 %v762_v7, %v763_v8  ;;  %v83_v8 = vpop.trf.xlu0 }
 0x130   :  { %v770_v46 = vrot.slane %v769_v29, 4  ;;  %v777_v49 = vsel %vm476_vm3, %v81_v45, -inf  ;;  %v394_v50 = vrot.slane %v393_v5, 1  ;;  %v751_v53 = vrot.slane %v750_v11, 1 }
 0x131   :  { %v776_v51 = vsel %vm474_vm2, %v80_v23, -inf  ;;  %v207_v20 = vrot.slane %v206_v35, 4  ;;  %v201_v13 = vmax.f32 %v199_v2, %v200_v17  ;;  %v399_v34 = vmax.f32 %v397_v39, %v398_v27 }
 0x132   :  { %v403_v16 = vmax.f32 %v204_v37, %v402_v33  ;;  %v778_v38 = vmax.f32 %v776_v51, %v777_v49  ;;  %v737_v6 = vrot.slane %v736_v36, 1  ;;  %v744_v63 = vrot.slane %v743_v52, 1 }
 0x133   :  { %v758_v40 = vrot.slane %v757_v21, 2  ;;  %v785_v60 = vsel %vm485_vm4, %v81_v45, -inf  ;;  %v461_v32 = vmax.f32 %v1205_v24, %v1212_v48  ;;  %v765_v57 = vrot.slane %v764_v59, 2 }
 0x134   :  { %v771_v42 = vmax.f32 %v769_v29, %v770_v46  ;;  %v408_v31 = vrot.slane %v205_v30, 4  ;;  %v395_v43 = vmax.f32 %v393_v5, %v394_v50  ;;  %v1223_v61 = vmax.f32 %v750_v11, %v751_v53 }
 0x135   :  { %v208_v23 = vmax.f32 %v206_v35, %v207_v20  ;;  %v779_v0 = vrot.slane %v778_v38, 4  ;;  %v202_v54 = vrot.slane %v201_v13, 1  ;;  %v400_v62 = vrot.slane %v399_v34, 1 }
 0x136   :  { %v404_v7 = vrot.slane %v403_v16, 2  ;;  %v786_v2 = vrot.slane %v785_v60, 4  ;;  %v241_v39 = vmax.f32 %v1203_v1, %v1216_v4  ;;  %v1227_v10 = vmax.f32 %v736_v36, %v737_v6 }
 0x137   :  { %v1229_v55 = vmax.f32 %v743_v52, %v744_v63  ;;  %v759_v24 = vmax.f32 %v757_v21, %v758_v40  ;;  %v766_v12 = vmax.f32 %v764_v59, %v765_v57  ;;  %v772_v37 = vrot.slane %v771_v42, 2  ;;  %v84_v63 = vpop.trf.xlu0 }
 0x138   :  { %v409_v45 = vmax.f32 %v205_v30, %v408_v31  ;;  %v792_v28 = vsel %vm466_vm1, %v82_v44, -inf  ;;  %v1232_v48 = vmax.f32 %v454_v19, %v395_v43  ;;  %v870_v5 = vmax.f32 %v1210_v22, %v1223_v61 }
 0x139   :  { %v209_v11 = vrot.slane %v208_v23, 2  ;;  %v780_v29 = vmax.f32 %v778_v38, %v779_v0  ;;  %v203_v17 = vmax.f32 %v201_v13, %v202_v54  ;;  %v401_v1 = vmax.f32 %v399_v34, %v400_v62 }
 0x13a   :  { %v405_v27 = vmax.f32 %v403_v16, %v404_v7  ;;  %v787_v33 = vmax.f32 %v785_v60, %v786_v2  ;;  %v213_v36 = vsel %vm86_vm0, %v82_v44, -inf  ;;  %v793_v52 = vrot.slane %v792_v28, 4 }
 0x13b   :  { %v214_v21 = vsel %vm86_vm0, %v83_v8, -inf  ;;  %v800_v30 = vsel %vm476_vm3, %v83_v8, -inf  ;;  %v760_v35 = vrot.slane %v759_v24, 1  ;;  %v767_v4 = vrot.slane %v766_v12, 1 }
 0x13c   :  { %v773_v19 = vmax.f32 %v771_v42, %v772_v37  ;;  %v410_v59 = vrot.slane %v409_v45, 2  ;;  %v210_v46 = vmax.f32 %v208_v23, %v209_v11  ;;  %v781_v49 = vrot.slane %v780_v29, 2 }
 0x13d   :  { %v799_v22 = vsel %vm474_vm2, %v82_v44, -inf  ;;  %v215_v50 = vmax.f32 %v213_v36, %v214_v21  ;;  %v1240_v53 = vmax.f32 %v461_v32, %v401_v1  ;;  %v788_v51 = vrot.slane %v787_v33, 2 }
 0x13e   :  { %v414_v20 = vrot.slane %v213_v36, 4  ;;  %v801_v13 = vmax.f32 %v799_v22, %v800_v30  ;;  %v406_v34 = vrot.slane %v405_v27, 1  ;;  %v794_v16 = vmax.f32 %v792_v28, %v793_v52 }
 0x13f   :  { %v216_v38 = vrot.slane %v215_v50, 4  ;;  %v808_v6 = vsel %vm485_vm4, %v83_v8, -inf  ;;  %v1243_v40 = vmax.f32 %v241_v39, %v203_v17  ;;  %v761_v60 = vmax.f32 %v759_v24, %v760_v35 }
 0x140   :  { %v1245_v57 = vmax.f32 %v766_v12, %v767_v4  ;;  %v774_v42 = vrot.slane %v773_v19, 1  ;;  %v211_v31 = vrot.slane %v210_v46, 1  ;;  %v411_v44 = vmax.f32 %v409_v45, %v410_v59 }
 0x141   :  { %v782_v43 = vmax.f32 %v780_v29, %v781_v49  ;;  %v809_v32 = vrot.slane %v808_v6, 4  ;;  %v789_v61 = vmax.f32 %v787_v33, %v788_v51  ;;  %v415_v23 = vmax.f32 %v213_v36, %v414_v20 }
 0x142   :  { %v802_v0 = vrot.slane %v801_v13, 4  ;;  %v222_v54 = vsel %vm86_vm0, %v84_v63, -inf  ;;  %v1248_v62 = vmax.f32 %v405_v27, %v406_v34  ;;  %v795_v7 = vrot.slane %v794_v16, 2 }
 0x143   :  { %v217_v2 = vmax.f32 %v215_v50, %v216_v38  ;;  %v420_v37 = vrot.slane %v214_v21, 4  ;;  %v875_v39 = vmax.f32 %v1227_v10, %v761_v60  ;;  %v775_v24 = vmax.f32 %v773_v19, %v774_v42 }
 0x144   :  { %v426_v12 = vrot.slane %v222_v54, 4  ;;  %v815_v28 = vsel %vm466_vm1, %v84_v63, -inf  ;;  %v1252_v8 = vmax.f32 %v210_v46, %v211_v31  ;;  %v412_v45 = vrot.slane %v411_v44, 1  ;;  %v85_v46 = vpop.trf.xlu0 }
 0x145   :  { %v783_v11 = vrot.slane %v782_v43, 1  ;;  %v810_v29 = vmax.f32 %v808_v6, %v809_v32  ;;  %v790_v17 = vrot.slane %v789_v61, 1  ;;  %v416_v1 = vrot.slane %v415_v23, 2 }
 0x146   :  { %v803_v33 = vmax.f32 %v801_v13, %v802_v0  ;;  %v816_v36 = vrot.slane %v815_v28, 4  ;;  %v880_v27 = vmax.f32 %v1229_v55, %v1245_v57  ;;  %v796_v52 = vmax.f32 %v794_v16, %v795_v7 }
 0x147   :  { %v218_v30 = vrot.slane %v217_v2, 2  ;;  %v421_v35 = vmax.f32 %v214_v21, %v420_v37  ;;  %v456_v10 = vmax.f32 %v1232_v48, %v1248_v62  ;;  %v1258_v4 = vmax.f32 %v870_v5, %v775_v24 }
 0x148   :  { %v427_v19 = vmax.f32 %v222_v54, %v426_v12  ;;  %v817_v59 = vmax.f32 %v815_v28, %v816_v36  ;;  %v243_v49 = vmax.f32 %v1243_v40, %v1252_v8  ;;  %v1262_v22 = vmax.f32 %v411_v44, %v412_v45 }
 0x149   :  { %v784_v50 = vmax.f32 %v782_v43, %v783_v11  ;;  %v811_v51 = vrot.slane %v810_v29, 2  ;;  %v791_v20 = vmax.f32 %v789_v61, %v790_v17  ;;  %v417_v13 = vmax.f32 %v415_v23, %v416_v1 }
 0x14a   :  { %v804_v34 = vrot.slane %v803_v33, 2  ;;  %v818_v16 = vrot.slane %v817_v59, 2  ;;  %v797_v21 = vrot.slane %v796_v52, 1  ;;  %v219_v38 = vmax.f32 %v217_v2, %v218_v30 }
 0x14b   :  { %v422_v6 = vrot.slane %v421_v35, 2  ;;  %v223_v5 = vsel %vm86_vm0, %v85_v46, -inf  ;;  %v428_v60 = vrot.slane %v427_v19, 2  ;;  %v822_v31 = vsel %vm474_vm2, %v84_v63, -inf }
 0x14c   :  { %v819_v42 = vmax.f32 %v817_v59, %v818_v16  ;;  %v224_v32 = vmax.f32 %v222_v54, %v223_v5  ;;  %v812_v0 = vmax.f32 %v810_v29, %v811_v51  ;;  %v432_v40 = vrot.slane %v223_v5, 4 }
 0x14d   :  { %v823_v44 = vsel %vm476_vm3, %v85_v46, -inf  ;;  %v831_v43 = vsel %vm485_vm4, %v85_v46, -inf  ;;  %v876_v61 = vmax.f32 %v875_v39, %v784_v50  ;;  %v805_v23 = vmax.f32 %v803_v33, %v804_v34 }
 0x14e   :  { %v225_v7 = vrot.slane %v224_v32, 4  ;;  %v824_v37 = vmax.f32 %v822_v31, %v823_v44  ;;  %v423_v24 = vmax.f32 %v421_v35, %v422_v6  ;;  %v820_v2 = vrot.slane %v819_v42, 1 }
 0x14f   :  { %v433_v12 = vmax.f32 %v223_v5, %v432_v40  ;;  %v832_v28 = vrot.slane %v831_v43, 4  ;;  %v220_v8 = vrot.slane %v219_v38, 1  ;;  %v429_v45 = vmax.f32 %v427_v19, %v428_v60 }
 0x150   :  { %v226_v11 = vmax.f32 %v224_v32, %v225_v7  ;;  %v825_v17 = vrot.slane %v824_v37, 4  ;;  %v798_v63 = vmax.f32 %v796_v52, %v797_v21  ;;  %v813_v54 = vrot.slane %v812_v0, 1 }
 0x151   :  { %v434_v29 = vrot.slane %v433_v12, 2  ;;  %v833_v1 = vmax.f32 %v831_v43, %v832_v28  ;;  %v418_v36 = vrot.slane %v417_v13, 1  ;;  %v806_v30 = vrot.slane %v805_v23, 1 }
 0x152   :  { %v227_v59 = vrot.slane %v226_v11, 2  ;;  %v826_v46 = vmax.f32 %v824_v37, %v825_v17  ;;  %v424_v39 = vrot.slane %v423_v24, 1  ;;  %v821_v33 = vmax.f32 %v819_v42, %v820_v2 }
 0x153   :  { %v435_v50 = vmax.f32 %v433_v12, %v434_v29  ;;  %v834_v51 = vrot.slane %v833_v1, 2  ;;  %v221_v35 = vmax.f32 %v219_v38, %v220_v8  ;;  %v430_v34 = vrot.slane %v429_v45, 1 }
 0x154   :  { %v228_v16 = vmax.f32 %v226_v11, %v227_v59  ;;  %v827_v6 = vrot.slane %v826_v46, 2  ;;  %v872_v19 = vmax.f32 %v1258_v4, %v798_v63  ;;  %v814_v5 = vmax.f32 %v812_v0, %v813_v54 }
 0x155   :  { %v436_v60 = vrot.slane %v435_v50, 1  ;;  %v835_v52 = vmax.f32 %v833_v1, %v834_v51  ;;  %v419_v21 = vmax.f32 %v417_v13, %v418_v36  ;;  %v807_v31 = vmax.f32 %v805_v23, %v806_v30 }
 0x156   :  { %v229_v32 = vrot.slane %v228_v16, 1  ;;  %v828_v40 = vmax.f32 %v826_v46, %v827_v6  ;;  %v881_v44 = vmax.f32 %v880_v27, %v791_v20  ;;  %v425_v42 = vmax.f32 %v423_v24, %v424_v39 }
 0x157   :  { %v873_v43 = vmax.f32 %v872_v19, %v821_v33  ;;  %v836_v7 = vrot.slane %v835_v52, 1  ;;  %v244_v38 = vmax.f32 %v243_v49, %v221_v35  ;;  %v431_v37 = vmax.f32 %v429_v45, %v430_v34 }
 0x158   :  { %v230_v2 = vmax.f32 %v228_v16, %v229_v32  ;;  %v829_v12 = vrot.slane %v828_v40, 1  ;;  %v463_v4 = vmax.f32 %v1240_v53, %v1262_v22  ;;  %v882_v0 = vmax.f32 %v881_v44, %v814_v5 }
 0x159   :  { %v437_v28 = vmax.f32 %v435_v50, %v436_v60  ;;  %v837_v13 = vmax.f32 %v835_v52, %v836_v7  ;;  %v457_v23 = vmax.f32 %v456_v10, %v419_v21  ;;  %v877_v8 = vmax.f32 %v876_v61, %v807_v31 }
 0x15a   :  { %v245_v55 = vmax.f32 %v244_v38, %v230_v2  ;;  %v830_v57 = vmax.f32 %v828_v40, %v829_v12  ;;  %v464_v27 = vmax.f32 %v463_v4, %v425_v42  ;;  %v874_v20 = vmax.f32 %v873_v43, 0.0 }
 0x15b   :  { %v883_v49 = vmax.f32 %v882_v0, %v837_v13  ;;  %v458_v24 = vmax.f32 %v457_v23, %v431_v37  ;;  %v847_v22 = vmax.f32 %v1055_v14, 0.0  ;;  %v852_v47 = vmax.f32 %v1057_v18, 0.0 }
 0x15c   :  { %v878_v45 = vmax.f32 %v877_v8, %v830_v57  ;;  %v886_v53 = vsel %vm885_vm5, %v245_v55, %v444_v15  ;;  %v465_v48 = vmax.f32 %v464_v27, %v437_v28  ;;  %v901_v11 = vsel %vm889_vm7, %v1181_v3, %v874_v20 }
 0x15d   :  { %v888_v62 = vsel %vm887_vm6, %v886_v53, %v451_v26  ;;  %v884_v17 = vmax.f32 %v883_v49, 0.0 }
 0x15e   :  { %v879_v10 = vmax.f32 %v878_v45, 0.0  ;;  %v890_v61 = vsel %vm889_vm7, %v888_v62, %v458_v24 }
 0x15f   :  { %v892_v41 = vsel %vm891_vm8, %v890_v61, %v465_v48 }
 0x160   :  { %v894_v14 = vsel %vm893_vm9, %v892_v41, %v842_v9  ;;  %v902_v15 = vsel %vm891_vm8, %v901_v11, %v879_v10 }
 0x161   :  { %v896_v25 = vsel %vm895_vm10, %v894_v14, %v847_v22  ;;  %v903_v58 = vsel %vm893_vm9, %v902_v15, %v884_v17 }
 0x162   :  { %v898_v26 = vsel %vm897_vm11, %v896_v25, %v852_v47  ;;  %906 = vst.msk [vmem:[%s1300_s1 + $0x8] sm:$0x3f] %vm905_vm12, %v903_v58 }
 0x163   :  { %904 = vst.msk [vmem:[%s1300_s1] sm:$0xff] %vm86_vm0, %v898_v26 }
 0x164   :  { %911 = vsyncpa [#allocation3], 1 }

</bundles_post_ra>
